<compile_context>
chip_gen: v7x
topology: tpu7x:2x2x1
jax: 0.10.0
libtpu: 0.0.40
codegen_flags: <defaults>
</compile_context>

<pallas_src>
import functools
import math

import jax
import jax.numpy as jnp
from jax.experimental import pallas as pl
from jax.experimental.pallas import tpu as pltpu

LEAKY_SLOPE = 0.01  # nn.LeakyReLU() default negative_slope


def _round_up(x, m):
    return (x + m - 1) // m * m


def _pad2d(x, rows, cols):
    return jnp.pad(x, ((0, rows - x.shape[0]), (0, cols - x.shape[1])))


def _mlp_gnn_kernel(feat_ref, adj_ref, w_in_ref, w_self_ref, w_neigh_ref, b_ref,
                    w1_ref, w2_ref, out_ref, h_pp, inv_deg_ref, pool_ref,
                    *, n_real, tile, pooling, adj_resident):
    f32, bf16 = jnp.float32, jnp.bfloat16
    l = pl.program_id(0)            # 0 = lin_in pass; 1..n_sage = SAGE layers
    t = pl.program_id(1)            # destination-node tile
    last_l = pl.num_programs(0) - 1
    n_tiles = pl.num_programs(1)

    start = pl.multiple_of(t * tile, tile)

    # ---------------- layer 0: h0 = lin_in(features), tile-wise ----------------------
    @pl.when(l == 0)
    def _():
        h0 = jnp.dot(feat_ref[...].astype(bf16), w_in_ref[...],
                     preferred_element_type=f32)
        h_dst0 = h_pp.at[0]
        h_dst0[pl.ds(start, tile), :] = h0.astype(bf16)

    # ---------------- layers >= 1: SAGEConv('mean') ----------------------------------
    @pl.when(l > 0)
    def _():
        # dst-tile slab of the adjacency (values 0/1, bf16)
        if adj_resident:
            adj_tile = adj_ref[pl.ds(start, tile), :]
        else:
            adj_tile = adj_ref[...]

        # Cache 1/in_degree once (first SAGE layer), exact reciprocal; reused afterwards.
        @pl.when(l == 1)
        def _():
            deg = jnp.sum(adj_tile.astype(f32), axis=1, keepdims=True)
            inv_deg_ref[pl.ds(start, tile), :] = jnp.where(deg > 0.0, 1.0 / deg, 0.0)

        inv_deg = inv_deg_ref[pl.ds(start, tile), :]               # (tile, 1) f32

        r_slot = (l - 1) & 1                                        # ping-pong by parity
        w_slot = l & 1
        h_src = h_pp.at[r_slot]

        # Mean aggregation on the MXU: bf16 inputs, f32 accumulation.
        h_neigh = jnp.dot(adj_tile, h_src[...],
                          preferred_element_type=f32) * inv_deg     # (tile, H) f32
        h_self = h_src[pl.ds(start, tile), :]                       # (tile, H) bf16

        h_new = (jnp.dot(h_self, w_self_ref[...], preferred_element_type=f32)
                 + jnp.dot(h_neigh.astype(bf16), w_neigh_ref[...],
                           preferred_element_type=f32)
                 + b_ref[...])                                      # (tile, H) f32

        h_dst = h_pp.at[w_slot]
        h_dst[pl.ds(start, tile), :] = h_new.astype(bf16)

        # -------- final layer: on-the-fly pooling (from f32 h_new) + readout ---------
        @pl.when(l == last_l)
        def _():
            row = jax.lax.broadcasted_iota(jnp.int32, h_new.shape, 0)
            valid = (row + start) < n_real                          # mask padded nodes
            if pooling == 'max':
                tile_red = jnp.max(jnp.where(valid, h_new, -jnp.inf),
                                   axis=0, keepdims=True)
            else:  # 'avg' / 'sum'
                tile_red = jnp.sum(jnp.where(valid, h_new, 0.0),
                                   axis=0, keepdims=True)

            @pl.when(t == 0)
            def _():
                if pooling == 'max':
                    pool_ref[...] = jnp.full(pool_ref.shape, -jnp.inf, pool_ref.dtype)
                else:
                    pool_ref[...] = jnp.zeros(pool_ref.shape, pool_ref.dtype)

            if pooling == 'max':
                pool_ref[...] = jnp.maximum(pool_ref[...], tile_red)
            else:
                pool_ref[...] = pool_ref[...] + tile_red

            @pl.when(t == n_tiles - 1)
            def _():
                y = pool_ref[...]
                if pooling == 'avg':
                    y = y * (1.0 / n_real)
                # Readout: Linear -> LeakyReLU -> Linear -> Sigmoid (tiny, f32)
                z = jnp.dot(y, w1_ref[...], preferred_element_type=f32)
                z = jnp.where(z > 0, z, LEAKY_SLOPE * z)
                z = jnp.dot(z, w2_ref[...], preferred_element_type=f32)
                out_ref[...] = jax.nn.sigmoid(z)


def mlp_gnn_forward(features, adj, params, *, pooling='avg', tile=None, adj_resident=None):
    """Fused MLPGNN forward pass (single graph, dense adjacency adj[dst, src])."""
    if pooling not in ('avg', 'sum', 'max'):
        raise ValueError('No pooling found!!!!')

    n, f_in = features.shape
    assert adj.shape == (n, n)
    hidden = params['w_in'].shape[1]
    n_sage = params['w_self'].shape[0]
    assert n_sage >= 1, "need at least one SAGEConv layer (num_layers >= 2)"
    f_out = params['w1'].shape[1]
    out_dim = params['w2'].shape[1]

    # Lane-dense padded widths (multiples of 128) -- zero padding is semantically inert.
    H = _round_up(hidden, 128)
    FO = _round_up(f_out, 128)

    if tile is None:
        tile = 256
    assert tile % 8 == 0, "dst tile must be a multiple of 8 (sublanes)"
    n_pad = _round_up(n, (tile * 128) // math.gcd(tile, 128))   # multiple of tile and 128
    n_tiles = n_pad // tile

    # ---- pad / cast operands ----
    feat_p = _pad2d(features, n_pad, f_in)
    adj_p = jnp.pad(adj, ((0, n_pad - n), (0, n_pad - n))).astype(jnp.bfloat16)
    w_in = _pad2d(params['w_in'], f_in, H).astype(jnp.bfloat16)
    w_self = jnp.pad(params['w_self'],
                     ((0, 0), (0, H - hidden), (0, H - hidden))).astype(jnp.bfloat16)
    w_neigh = jnp.pad(params['w_neigh'],
                      ((0, 0), (0, H - hidden), (0, H - hidden))).astype(jnp.bfloat16)
    b = jnp.pad(params['b_sage'], ((0, 0), (0, 0), (0, H - hidden))).astype(jnp.float32)
    w1 = _pad2d(params['w1'], H, FO).astype(jnp.float32)
    w2 = _pad2d(params['w2'], FO, out_dim).astype(jnp.float32)

    # ---- VMEM budget / adjacency residency decision ----
    try:
        vmem_phys = int(getattr(pltpu.get_tpu_info(), 'vmem_capacity_bytes', 64 << 20))
    except Exception:
        vmem_phys = 64 << 20
    budget = min(vmem_phys, 128 << 20) - (4 << 20)

    adj_bytes = n_pad * n_pad * 2                 # bf16
    h_bytes = 2 * n_pad * H * 2                   # bf16 ping-pong scratch
    if adj_resident is None:
        adj_resident = (n_sage >= 2) and (2 * adj_bytes + h_bytes + (16 << 20) <= budget)

    adj_buf_bytes = 2 * adj_bytes if adj_resident else 2 * tile * n_pad * 2
    footprint = (h_bytes + adj_buf_bytes
                 + 2 * tile * f_in * feat_p.dtype.itemsize    # streamed feature buffers
                 + n_pad * 512                                # (N_pad,1) inv_deg layout
                 + 4 * (H * H * 2) + H * FO * 4 + (2 << 20))  # weights + slack
    vmem_limit = int(min(budget, max(32 << 20, footprint + (8 << 20))))

    # ---- BlockSpecs ----
    if adj_resident:
        adj_spec = pl.BlockSpec((n_pad, n_pad), lambda l, t: (0, 0))          # fetched once
    else:
        adj_spec = pl.BlockSpec((tile, n_pad),
                                lambda l, t: (jnp.where(l == 0, 0, t), 0))    # streamed slab

    feat_spec = pl.BlockSpec((tile, f_in),
                             lambda l, t: (jnp.where(l == 0, t, 0), 0))       # layer-0 only

    def sage_idx(l, t):
        return (jnp.maximum(l - 1, 0), 0, 0)

    in_specs = [
        feat_spec,
        adj_spec,
        pl.BlockSpec((f_in, H), lambda l, t: (0, 0)),            # W_in (resident, small)
        pl.BlockSpec((pl.Squeezed(), H, H), sage_idx),           # W_self[layer]
        pl.BlockSpec((pl.Squeezed(), H, H), sage_idx),           # W_neigh[layer]
        pl.BlockSpec((pl.Squeezed(), 1, H), sage_idx),           # bias[layer]
        pl.BlockSpec((H, FO), lambda l, t: (0, 0)),              # W1
        pl.BlockSpec((FO, out_dim), lambda l, t: (0, 0)),        # W2
    ]

    kernel = functools.partial(_mlp_gnn_kernel, n_real=n, tile=tile,
                               pooling=pooling, adj_resident=adj_resident)

    return pl.pallas_call(
        kernel,
        out_shape=jax.ShapeDtypeStruct((1, out_dim), jnp.float32),
        grid=(n_sage + 1, n_tiles),
        in_specs=in_specs,
        out_specs=pl.BlockSpec((1, out_dim), lambda l, t: (0, 0)),
        scratch_shapes=[
            pltpu.VMEM((2, n_pad, H), jnp.bfloat16),     # h ping-pong (layer parity)
            pltpu.VMEM((n_pad, 1), jnp.float32),         # cached 1/in_degree
            pltpu.VMEM((1, H), jnp.float32),             # pooling accumulator
        ],
        compiler_params=pltpu.CompilerParams(
            dimension_semantics=("arbitrary", "arbitrary"),
            vmem_limit_bytes=vmem_limit),
    )(feat_p, adj_p, w_in, w_self, w_neigh, b, w1, w2)


def init_params(key, in_feat, hidden_feat, out_feat, out_dim, num_layers):
    """Deterministic synthetic parameters (shapes match the PyTorch module)."""
    n_sage = num_layers - 1
    ks = jax.random.split(key, 5)

    def lin(k, fan_in, fan_out, extra=()):
        bound = 1.0 / (fan_in ** 0.5)
        return jax.random.uniform(k, extra + (fan_in, fan_out),
                                  jnp.float32, -bound, bound)

    return {
        'w_in':    lin(ks[0], in_feat, hidden_feat),                  # lin_in.weight^T
        'w_self':  lin(ks[1], hidden_feat, hidden_feat, (n_sage,)),   # fc_self.weight^T / layer
        'w_neigh': lin(ks[2], hidden_feat, hidden_feat, (n_sage,)),   # fc_neigh.weight^T / layer
        'b_sage':  jnp.zeros((n_sage, 1, hidden_feat), jnp.float32),  # DGL SAGEConv bias (init 0)
        'w1':      lin(ks[3], hidden_feat, out_feat),                 # linear_1.weight^T
        'w2':      lin(ks[4], out_feat, out_dim),                     # linear_2.weight^T
    }


def _reference_forward(features, adj, params, pooling):
    """Plain-JAX f32 reference mirroring the PyTorch/DGL semantics."""
    deg = jnp.sum(adj, axis=1, keepdims=True)
    inv_deg = jnp.where(deg > 0, 1.0 / deg, 0.0)
    h = features @ params['w_in']
    for l in range(params['w_self'].shape[0]):
        h_neigh = (adj @ h) * inv_deg
        h = h @ params['w_self'][l] + h_neigh @ params['w_neigh'][l] + params['b_sage'][l]
    if pooling == 'avg':
        y = jnp.mean(h, axis=0, keepdims=True)
    elif pooling == 'sum':
        y = jnp.sum(h, axis=0, keepdims=True)
    elif pooling == 'max':
        y = jnp.max(h, axis=0, keepdims=True)
    else:
        raise ValueError('No pooling found!!!!')
    z = y @ params['w1']
    z = jnp.where(z > 0, z, LEAKY_SLOPE * z)
    return jax.nn.sigmoid(z @ params['w2'])


if __name__ == "__main__":
    # Small module-consistent shapes. N=200 with tile=64 exercises node padding (200 -> 256),
    # four streamed dst tiles, masked pooling and the cached-inv_deg / ping-pong paths.
    N, in_feat, hidden_feat, out_feat, out_dim = 200, 8, 32, 16, 2
    num_layers = 3      # -> 2 SAGEConv layers
    pooling = 'avg'

    key = jax.random.PRNGKey(0)
    k_feat, k_param = jax.random.split(key)

    features = jax.random.normal(k_feat, (N, in_feat), jnp.float32)

    # Deterministic ring graph: every node has exactly 2 in-neighbors. adj[dst, src] = 1.
    idx = jnp.arange(N)
    adj = jnp.zeros((N, N), jnp.float32)
    adj = adj.at[idx, (idx + 1) % N].set(1.0)
    adj = adj.at[idx, (idx - 1) % N].set(1.0)

    params = init_params(k_param, in_feat, hidden_feat, out_feat, out_dim, num_layers)
    ref = _reference_forward(features, adj, params, pooling)

    # 1) Streamed-adjacency path (multiple dst tiles).
    out_stream = mlp_gnn_forward(features, adj, params, pooling=pooling,
                                 tile=64, adj_resident=False)
    jax.block_until_ready(out_stream)
    assert out_stream.shape == (1, out_dim)
    # bf16 MXU inputs / bf16 resident h (f32 accumulation) -> loosened f32 tolerance.
    assert jnp.allclose(out_stream, ref, rtol=2e-2, atol=2e-2), (out_stream, ref)

    # 2) Auto path (resident adjacency for this small graph, default tile).
    out_auto = mlp_gnn_forward(features, adj, params, pooling=pooling)
    jax.block_until_ready(out_auto)
    assert jnp.allclose(out_auto, ref, rtol=2e-2, atol=2e-2), (out_auto, ref)

    print("KERNEL_OK")
</pallas_src>

<mosaic_0001>
module attributes {stable_mosaic.version = 11 : i64} {
  func.func @_mlp_gnn_kernel(%arg0: i32, %arg1: i32, %arg2: memref<64x8xf32, #tpu.memory_space<vmem>>, %arg3: memref<64x256xbf16, #tpu.memory_space<vmem>>, %arg4: memref<8x128xbf16, #tpu.memory_space<vmem>>, %arg5: memref<1x128x128xbf16, #tpu.memory_space<vmem>>, %arg6: memref<1x128x128xbf16, #tpu.memory_space<vmem>>, %arg7: memref<1x1x128xf32, #tpu.memory_space<vmem>>, %arg8: memref<128x128xf32, #tpu.memory_space<vmem>>, %arg9: memref<128x2xf32, #tpu.memory_space<vmem>>, %arg10: memref<1x2xf32, #tpu.memory_space<vmem>>, %arg11: memref<2x256x128xbf16, #tpu.memory_space<vmem>>, %arg12: memref<256x1xf32, #tpu.memory_space<vmem>>, %arg13: memref<1x128xf32, #tpu.memory_space<vmem>>) attributes {dimension_semantics = [#tpu.dimension_semantics<arbitrary>, #tpu.dimension_semantics<arbitrary>], iteration_bounds = array<i64: 3, 4>, scalar_prefetch = 0 : i64, scratch_operands = 3 : i64, tpu.core_type = #tpu.core_type<tc>, window_params = [{transform_indices = @transform_0, window_bounds = array<i64: 64, 8>}, {transform_indices = @transform_1, window_bounds = array<i64: 64, 256>}, {pipeline_mode = #tpu.pipeline_mode<synchronous>, transform_indices = @transform_2, window_bounds = array<i64: 8, 128>}, {transform_indices = @transform_3, window_bounds = array<i64: 1, 128, 128>}, {transform_indices = @transform_4, window_bounds = array<i64: 1, 128, 128>}, {transform_indices = @transform_5, window_bounds = array<i64: 1, 1, 128>}, {pipeline_mode = #tpu.pipeline_mode<synchronous>, transform_indices = @transform_6, window_bounds = array<i64: 128, 128>}, {pipeline_mode = #tpu.pipeline_mode<synchronous>, transform_indices = @transform_7, window_bounds = array<i64: 128, 2>}, {pipeline_mode = #tpu.pipeline_mode<synchronous>, transform_indices = @transform_8, window_bounds = array<i64: 1, 2>}]} {
    %c64_i32 = arith.constant 64 : i32
    %0 = arith.muli %arg1, %c64_i32 : i32
    %1 = tpu.assume_multiple %0, 64 : i32
    %c0_i32 = arith.constant 0 : i32
    %2 = arith.cmpi eq, %arg0, %c0_i32 : i32
    %3 = arith.extui %2 : i1 to i32
    %c0_i32_0 = arith.constant 0 : i32
    %4 = arith.cmpi ne, %3, %c0_i32_0 : i32
    scf.if %4 {
      %c0 = arith.constant 0 : index
      %c0_3 = arith.constant 0 : index
      %8 = vector.load %arg2[%c0, %c0_3] : memref<64x8xf32, #tpu.memory_space<vmem>>, vector<64x8xf32>
      %9 = arith.truncf %8 : vector<64x8xf32> to vector<64x8xbf16>
      %c0_4 = arith.constant 0 : index
      %c0_5 = arith.constant 0 : index
      %10 = vector.load %arg4[%c0_4, %c0_5] : memref<8x128xbf16, #tpu.memory_space<vmem>>, vector<8x128xbf16>
      %cst = arith.constant dense<0.000000e+00> : vector<64x128xf32>
      %11 = tpu.matmul %9, %10, %cst {dimension_numbers = #tpu.dot_dimension_numbers<[1], [0], [0], [1], [0, 0, 1, 1], [], []>} : vector<64x8xbf16>, vector<8x128xbf16>, vector<64x128xf32> -> vector<64x128xf32>
      %12 = arith.truncf %11 : vector<64x128xf32> to vector<64x128xbf16>
      %c0_i32_6 = arith.constant 0 : i32
      %c0_i32_7 = arith.constant 0 : i32
      %c0_i32_8 = arith.constant 0 : i32
      %13 = tpu.memref_slice %arg11[%c0_i32_6, %c0_i32_7, %c0_i32_8] : memref<2x256x128xbf16, #tpu.memory_space<vmem>> -> memref<1x256x128xbf16, #tpu.memory_space<vmem>>
      %14 = tpu.memref_squeeze %13 : memref<1x256x128xbf16, #tpu.memory_space<vmem>> -> memref<256x128xbf16, #tpu.memory_space<vmem>>
      %15 = arith.index_cast %1 : i32 to index
      %c0_9 = arith.constant 0 : index
      %16 = vector.load %14[%15, %c0_9] : memref<256x128xbf16, #tpu.memory_space<vmem>>, vector<64x128xbf16>
      tpu.vector_store %14[%15, %c0_9], %12 {strides = array<i32>} : memref<256x128xbf16, #tpu.memory_space<vmem>>, vector<64x128xbf16>,
    } else {
    }
    %c0_i32_1 = arith.constant 0 : i32
    %5 = arith.cmpi sgt, %arg0, %c0_i32_1 : i32
    %6 = arith.extui %5 : i1 to i32
    %c0_i32_2 = arith.constant 0 : i32
    %7 = arith.cmpi ne, %6, %c0_i32_2 : i32
    scf.if %7 {
      %c0 = arith.constant 0 : index
      %c0_3 = arith.constant 0 : index
      %8 = vector.load %arg3[%c0, %c0_3] : memref<64x256xbf16, #tpu.memory_space<vmem>>, vector<64x256xbf16>
      %c1_i32 = arith.constant 1 : i32
      %9 = arith.cmpi eq, %arg0, %c1_i32 : i32
      %10 = arith.extui %9 : i1 to i32
      %c0_i32_4 = arith.constant 0 : i32
      %11 = arith.cmpi ne, %10, %c0_i32_4 : i32
      scf.if %11 {
        %47 = arith.extf %8 : vector<64x256xbf16> to vector<64x256xf32>
        %cst_29 = arith.constant dense<0.000000e+00> : vector<64xf32>
        %48 = vector.multi_reduction <add>, %47, %cst_29 [1] : vector<64x256xf32> to vector<64xf32>
        %49 = vector.shape_cast %48 : vector<64xf32> to vector<64x1xf32>
        %cst_30 = arith.constant 0.000000e+00 : f32
        %50 = vector.broadcast %cst_30 : f32 to vector<64x1xf32>
        %51 = arith.cmpf ogt, %49, %50 : vector<64x1xf32>
        %cst_31 = arith.constant 1.000000e+00 : f32
        %52 = vector.broadcast %cst_31 : f32 to vector<64x1xf32>
        %53 = arith.divf %52, %49 : vector<64x1xf32>
        %cst_32 = arith.constant 0.000000e+00 : f32
        %54 = vector.broadcast %cst_32 : f32 to vector<64x1xf32>
        %55 = arith.select %51, %53, %54 : vector<64x1xi1>, vector<64x1xf32>
        %56 = arith.index_cast %1 : i32 to index
        %c0_33 = arith.constant 0 : index
        %57 = vector.load %arg12[%56, %c0_33] : memref<256x1xf32, #tpu.memory_space<vmem>>, vector<64x1xf32>
        tpu.vector_store %arg12[%56, %c0_33], %55 {strides = array<i32>} : memref<256x1xf32, #tpu.memory_space<vmem>>, vector<64x1xf32>,
      } else {
      }
      %12 = arith.index_cast %1 : i32 to index
      %c0_5 = arith.constant 0 : index
      %13 = vector.load %arg12[%12, %c0_5] : memref<256x1xf32, #tpu.memory_space<vmem>>, vector<64x1xf32>
      %c1_i32_6 = arith.constant 1 : i32
      %14 = arith.subi %arg0, %c1_i32_6 : i32
      %c1_i32_7 = arith.constant 1 : i32
      %15 = arith.andi %14, %c1_i32_7 : i32
      %c1_i32_8 = arith.constant 1 : i32
      %16 = arith.andi %arg0, %c1_i32_8 : i32
      %17 = arith.index_cast %15 : i32 to index
      %c0_9 = arith.constant 0 : index
      %c0_10 = arith.constant 0 : index
      %18 = vector.load %arg11[%17, %c0_9, %c0_10] : memref<2x256x128xbf16, #tpu.memory_space<vmem>>, vector<1x256x128xbf16>
      %19 = vector.shape_cast %18 : vector<1x256x128xbf16> to vector<256x128xbf16>
      %cst = arith.constant dense<0.000000e+00> : vector<64x128xf32>
      %20 = tpu.matmul %8, %19, %cst {dimension_numbers = #tpu.dot_dimension_numbers<[1], [0], [0], [1], [0, 0, 1, 1], [], []>} : vector<64x256xbf16>, vector<256x128xbf16>, vector<64x128xf32> -> vector<64x128xf32>
      %21 = vector.broadcast %13 : vector<64x1xf32> to vector<64x128xf32>
      %22 = arith.mulf %20, %21 : vector<64x128xf32>
      %c0_i32_11 = arith.constant 0 : i32
      %c0_i32_12 = arith.constant 0 : i32
      %23 = tpu.memref_slice %arg11[%15, %c0_i32_11, %c0_i32_12] : memref<2x256x128xbf16, #tpu.memory_space<vmem>> -> memref<1x256x128xbf16, #tpu.memory_space<vmem>>
      %24 = tpu.memref_squeeze %23 : memref<1x256x128xbf16, #tpu.memory_space<vmem>> -> memref<256x128xbf16, #tpu.memory_space<vmem>>
      %25 = arith.index_cast %1 : i32 to index
      %c0_13 = arith.constant 0 : index
      %26 = vector.load %24[%25, %c0_13] : memref<256x128xbf16, #tpu.memory_space<vmem>>, vector<64x128xbf16>
      %c0_14 = arith.constant 0 : index
      %c0_15 = arith.constant 0 : index
      %c0_16 = arith.constant 0 : index
      %27 = vector.load %arg5[%c0_14, %c0_15, %c0_16] : memref<1x128x128xbf16, #tpu.memory_space<vmem>>, vector<1x128x128xbf16>
      %28 = vector.shape_cast %27 : vector<1x128x128xbf16> to vector<128x128xbf16>
      %cst_17 = arith.constant dense<0.000000e+00> : vector<64x128xf32>
      %29 = tpu.matmul %26, %28, %cst_17 {dimension_numbers = #tpu.dot_dimension_numbers<[1], [0], [0], [1], [0, 0, 1, 1], [], []>} : vector<64x128xbf16>, vector<128x128xbf16>, vector<64x128xf32> -> vector<64x128xf32>
      %30 = arith.truncf %22 : vector<64x128xf32> to vector<64x128xbf16>
      %c0_18 = arith.constant 0 : index
      %c0_19 = arith.constant 0 : index
      %c0_20 = arith.constant 0 : index
      %31 = vector.load %arg6[%c0_18, %c0_19, %c0_20] : memref<1x128x128xbf16, #tpu.memory_space<vmem>>, vector<1x128x128xbf16>
      %32 = vector.shape_cast %31 : vector<1x128x128xbf16> to vector<128x128xbf16>
      %cst_21 = arith.constant dense<0.000000e+00> : vector<64x128xf32>
      %33 = tpu.matmul %30, %32, %cst_21 {dimension_numbers = #tpu.dot_dimension_numbers<[1], [0], [0], [1], [0, 0, 1, 1], [], []>} : vector<64x128xbf16>, vector<128x128xbf16>, vector<64x128xf32> -> vector<64x128xf32>
      %34 = arith.addf %29, %33 : vector<64x128xf32>
      %c0_22 = arith.constant 0 : index
      %c0_23 = arith.constant 0 : index
      %c0_24 = arith.constant 0 : index
      %35 = vector.load %arg7[%c0_22, %c0_23, %c0_24] : memref<1x1x128xf32, #tpu.memory_space<vmem>>, vector<1x1x128xf32>
      %36 = vector.shape_cast %35 : vector<1x1x128xf32> to vector<1x128xf32>
      %37 = vector.broadcast %36 : vector<1x128xf32> to vector<64x128xf32>
      %38 = arith.addf %34, %37 : vector<64x128xf32>
      %39 = arith.truncf %38 : vector<64x128xf32> to vector<64x128xbf16>
      %c0_i32_25 = arith.constant 0 : i32
      %c0_i32_26 = arith.constant 0 : i32
      %40 = tpu.memref_slice %arg11[%16, %c0_i32_25, %c0_i32_26] : memref<2x256x128xbf16, #tpu.memory_space<vmem>> -> memref<1x256x128xbf16, #tpu.memory_space<vmem>>
      %41 = tpu.memref_squeeze %40 : memref<1x256x128xbf16, #tpu.memory_space<vmem>> -> memref<256x128xbf16, #tpu.memory_space<vmem>>
      %42 = arith.index_cast %1 : i32 to index
      %c0_27 = arith.constant 0 : index
      %43 = vector.load %41[%42, %c0_27] : memref<256x128xbf16, #tpu.memory_space<vmem>>, vector<64x128xbf16>
      tpu.vector_store %41[%42, %c0_27], %39 {strides = array<i32>} : memref<256x128xbf16, #tpu.memory_space<vmem>>, vector<64x128xbf16>,
      %c2_i32 = arith.constant 2 : i32
      %44 = arith.cmpi eq, %arg0, %c2_i32 : i32
      %45 = arith.extui %44 : i1 to i32
      %c0_i32_28 = arith.constant 0 : i32
      %46 = arith.cmpi ne, %45, %c0_i32_28 : i32
      scf.if %46 {
        %47 = tpu.iota {dimensions = array<i32: 0>} : vector<64x128xi32>
        %48 = vector.broadcast %1 : i32 to vector<64x128xi32>
        %49 = arith.addi %47, %48 : vector<64x128xi32>
        %c200_i32 = arith.constant 200 : i32
        %50 = vector.broadcast %c200_i32 : i32 to vector<64x128xi32>
        %51 = arith.cmpi slt, %49, %50 : vector<64x128xi32>
        %cst_29 = arith.constant 0.000000e+00 : f32
        %52 = vector.broadcast %cst_29 : f32 to vector<64x128xf32>
        %53 = arith.select %51, %38, %52 : vector<64x128xi1>, vector<64x128xf32>
        %cst_30 = arith.constant dense<0.000000e+00> : vector<128xf32>
        %54 = vector.multi_reduction <add>, %53, %cst_30 [0] : vector<64x128xf32> to vector<128xf32>
        %55 = vector.shape_cast %54 : vector<128xf32> to vector<1x128xf32>
        %c0_i32_31 = arith.constant 0 : i32
        %56 = arith.cmpi eq, %arg1, %c0_i32_31 : i32
        %57 = arith.extui %56 : i1 to i32
        %c0_i32_32 = arith.constant 0 : i32
        %58 = arith.cmpi ne, %57, %c0_i32_32 : i32
        scf.if %58 {
          %cst_38 = arith.constant 0.000000e+00 : f32
          %65 = vector.broadcast %cst_38 : f32 to vector<1x128xf32>
          %c0_39 = arith.constant 0 : index
          %c0_40 = arith.constant 0 : index
          %66 = vector.load %arg13[%c0_39, %c0_40] : memref<1x128xf32, #tpu.memory_space<vmem>>, vector<1x128xf32>
          tpu.vector_store %arg13[%c0_39, %c0_40], %65 {strides = array<i32>} : memref<1x128xf32, #tpu.memory_space<vmem>>, vector<1x128xf32>,
        } else {
        }
        %c0_33 = arith.constant 0 : index
        %c0_34 = arith.constant 0 : index
        %59 = vector.load %arg13[%c0_33, %c0_34] : memref<1x128xf32, #tpu.memory_space<vmem>>, vector<1x128xf32>
        %60 = arith.addf %59, %55 : vector<1x128xf32>
        %c0_35 = arith.constant 0 : index
        %c0_36 = arith.constant 0 : index
        %61 = vector.load %arg13[%c0_35, %c0_36] : memref<1x128xf32, #tpu.memory_space<vmem>>, vector<1x128xf32>
        tpu.vector_store %arg13[%c0_35, %c0_36], %60 {strides = array<i32>} : memref<1x128xf32, #tpu.memory_space<vmem>>, vector<1x128xf32>,
        %c3_i32 = arith.constant 3 : i32
        %62 = arith.cmpi eq, %arg1, %c3_i32 : i32
        %63 = arith.extui %62 : i1 to i32
        %c0_i32_37 = arith.constant 0 : i32
        %64 = arith.cmpi ne, %63, %c0_i32_37 : i32
        scf.if %64 {
          %c0_38 = arith.constant 0 : index
          %c0_39 = arith.constant 0 : index
          %65 = vector.load %arg13[%c0_38, %c0_39] : memref<1x128xf32, #tpu.memory_space<vmem>>, vector<1x128xf32>
          %cst_40 = arith.constant 5.000000e-03 : f32
          %66 = vector.broadcast %cst_40 : f32 to vector<1x128xf32>
          %67 = arith.mulf %65, %66 : vector<1x128xf32>
          %c0_41 = arith.constant 0 : index
          %c0_42 = arith.constant 0 : index
          %68 = vector.load %arg8[%c0_41, %c0_42] : memref<128x128xf32, #tpu.memory_space<vmem>>, vector<128x128xf32>
          %cst_43 = arith.constant dense<0.000000e+00> : vector<1x128xf32>
          %69 = tpu.matmul %67, %68, %cst_43 {dimension_numbers = #tpu.dot_dimension_numbers<[1], [0], [0], [1], [0, 0, 1, 1], [], []>} : vector<1x128xf32>, vector<128x128xf32>, vector<1x128xf32> -> vector<1x128xf32>
          %cst_44 = arith.constant 0.000000e+00 : f32
          %70 = vector.broadcast %cst_44 : f32 to vector<1x128xf32>
          %71 = arith.cmpf ogt, %69, %70 : vector<1x128xf32>
          %cst_45 = arith.constant 0.00999999977 : f32
          %72 = vector.broadcast %cst_45 : f32 to vector<1x128xf32>
          %73 = arith.mulf %72, %69 : vector<1x128xf32>
          %74 = arith.select %71, %69, %73 : vector<1x128xi1>, vector<1x128xf32>
          %c0_46 = arith.constant 0 : index
          %c0_47 = arith.constant 0 : index
          %75 = vector.load %arg9[%c0_46, %c0_47] : memref<128x2xf32, #tpu.memory_space<vmem>>, vector<128x2xf32>
          %cst_48 = arith.constant dense<0.000000e+00> : vector<1x2xf32>
          %76 = tpu.matmul %74, %75, %cst_48 {dimension_numbers = #tpu.dot_dimension_numbers<[1], [0], [0], [1], [0, 0, 1, 1], [], []>} : vector<1x128xf32>, vector<128x2xf32>, vector<1x2xf32> -> vector<1x2xf32>
          %77 = arith.negf %76 : vector<1x2xf32>
          %78 = math.exp %77 : vector<1x2xf32>
          %cst_49 = arith.constant 1.000000e+00 : f32
          %79 = vector.broadcast %cst_49 : f32 to vector<1x2xf32>
          %80 = arith.addf %79, %78 : vector<1x2xf32>
          %81 = arith.divf %79, %80 : vector<1x2xf32>
          %c0_50 = arith.constant 0 : index
          %c0_51 = arith.constant 0 : index
          %82 = vector.load %arg10[%c0_50, %c0_51] : memref<1x2xf32, #tpu.memory_space<vmem>>, vector<1x2xf32>
          tpu.vector_store %arg10[%c0_50, %c0_51], %81 {strides = array<i32>} : memref<1x2xf32, #tpu.memory_space<vmem>>, vector<1x2xf32>,
        } else {
        }
      } else {
      }
    } else {
    }
    return
  }
  func.func @transform_0(%arg0: i32, %arg1: i32) -> (i32, i32) {
    %c0_i32 = arith.constant 0 : i32
    %0 = arith.cmpi eq, %arg0, %c0_i32 : i32
    %c0_i32_0 = arith.constant 0 : i32
    %1 = arith.select %0, %arg1, %c0_i32_0 : i32
    %c0_i32_1 = arith.constant 0 : i32
    %c0_i32_2 = arith.constant 0 : i32
    return %1, %c0_i32_1 : i32, i32
  }
  func.func @transform_1(%arg0: i32, %arg1: i32) -> (i32, i32) {
    %c0_i32 = arith.constant 0 : i32
    %0 = arith.cmpi eq, %arg0, %c0_i32 : i32
    %c0_i32_0 = arith.constant 0 : i32
    %1 = arith.select %0, %c0_i32_0, %arg1 : i32
    %c0_i32_1 = arith.constant 0 : i32
    %c0_i32_2 = arith.constant 0 : i32
    return %1, %c0_i32_1 : i32, i32
  }
  func.func @transform_2(%arg0: i32, %arg1: i32) -> (i32, i32) {
    %c0_i32 = arith.constant 0 : i32
    %c0_i32_0 = arith.constant 0 : i32
    %c0_i32_1 = arith.constant 0 : i32
    return %c0_i32, %c0_i32_0 : i32, i32
  }
  func.func @transform_3(%arg0: i32, %arg1: i32) -> (i32, i32, i32) {
    %c1_i32 = arith.constant 1 : i32
    %0 = arith.subi %arg0, %c1_i32 : i32
    %c0_i32 = arith.constant 0 : i32
    %1 = arith.maxsi %0, %c0_i32 : i32
    %c0_i32_0 = arith.constant 0 : i32
    %c0_i32_1 = arith.constant 0 : i32
    %c0_i32_2 = arith.constant 0 : i32
    return %1, %c0_i32_0, %c0_i32_1 : i32, i32, i32
  }
  func.func @transform_4(%arg0: i32, %arg1: i32) -> (i32, i32, i32) {
    %c1_i32 = arith.constant 1 : i32
    %0 = arith.subi %arg0, %c1_i32 : i32
    %c0_i32 = arith.constant 0 : i32
    %1 = arith.maxsi %0, %c0_i32 : i32
    %c0_i32_0 = arith.constant 0 : i32
    %c0_i32_1 = arith.constant 0 : i32
    %c0_i32_2 = arith.constant 0 : i32
    return %1, %c0_i32_0, %c0_i32_1 : i32, i32, i32
  }
  func.func @transform_5(%arg0: i32, %arg1: i32) -> (i32, i32, i32) {
    %c1_i32 = arith.constant 1 : i32
    %0 = arith.subi %arg0, %c1_i32 : i32
    %c0_i32 = arith.constant 0 : i32
    %1 = arith.maxsi %0, %c0_i32 : i32
    %c0_i32_0 = arith.constant 0 : i32
    %c0_i32_1 = arith.constant 0 : i32
    %c0_i32_2 = arith.constant 0 : i32
    return %1, %c0_i32_0, %c0_i32_1 : i32, i32, i32
  }
  func.func @transform_6(%arg0: i32, %arg1: i32) -> (i32, i32) {
    %c0_i32 = arith.constant 0 : i32
    %c0_i32_0 = arith.constant 0 : i32
    %c0_i32_1 = arith.constant 0 : i32
    return %c0_i32, %c0_i32_0 : i32, i32
  }
  func.func @transform_7(%arg0: i32, %arg1: i32) -> (i32, i32) {
    %c0_i32 = arith.constant 0 : i32
    %c0_i32_0 = arith.constant 0 : i32
    %c0_i32_1 = arith.constant 0 : i32
    return %c0_i32, %c0_i32_0 : i32, i32
  }
  func.func @transform_8(%arg0: i32, %arg1: i32) -> (i32, i32) {
    %c0_i32 = arith.constant 0 : i32
    %c0_i32_0 = arith.constant 0 : i32
    %c0_i32_1 = arith.constant 0 : i32
    return %c0_i32, %c0_i32_0 : i32, i32
  }
}

</mosaic_0001>

<bundles_post_ra>
// kernel: tpu_custom_call.1
= control target key start
LH: loop header
LB: loop body
LE: loop exit
PB: predicated region body
PF: predicated region fallthrough
CT: control target
= control target key end

     0   :  { %s2835_s0 = inlined_call_operand.vmem [shape: f32[256,8], index: 0, kind: input, shape index: {}]   ;;  %s2836_s1 = inlined_call_operand.vmem [shape: bf16[256,256], index: 1, kind: input, shape index: {}]   ;;  %s2837_s2 = inlined_call_operand.vmem [shape: bf16[8,128], index: 2, kind: input, shape index: {}]   ;;  %s2838_s3 = inlined_call_operand.vmem [shape: bf16[2,128,128], index: 3, kind: input, shape index: {}]   ;;  %s2839_s4 = inlined_call_operand.hbm [shape: bf16[2,128,128], index: 4, kind: input, shape index: {}]   ;;  %s2840_s5 = inlined_call_operand.vmem [shape: f32[2,1,128], index: 5, kind: input, shape index: {}]   ;;  %s2841_s6 = inlined_call_operand.hbm [shape: f32[128,128], index: 6, kind: input, shape index: {}]   ;;  %s2842_s7 = inlined_call_operand.vmem [shape: f32[128,2], index: 7, kind: input, shape index: {}]   ;;  %s2843_s8 = inlined_call_operand.hbm [shape: f32[1,2], index: 8, kind: output, shape index: {}]  }
   0x1   :  { %2852 = sst [smem:[#allocation19_spill]] %s2839_s4 }
   0x2   :  { %2853 = sst [smem:[#allocation20_spill]] %s2841_s6 }
   0x3   :  { %13 = vsyncpa [#allocation6], 0 }
   0x4   :  { %15 = vsyncpa [#allocation6 + $0x1], 0 }
   0x5   :  { %16 = vsyncpa [#allocation9], 0 }
   0x6   :  { %17 = vsyncpa [#allocation7], 0  ;;  %s2335_s27 = smov 0   ;;  %s2337_s28 = smov 0  }
   0x7   :  { %s2339_s29 = smov 0   ;;  %s2341_s30 = smov 0  }
   0x8   :  { %s2343_s9 = smov 0   ;;  %s2345_s10 = smov 0  }
   0x9   :  { %s2347_s11 = smov 0   ;;  %s2349_s12 = smov 0  }
   0xa LB: > { %2854 = sst [smem:[#allocation14_spill]] %s2268_s10  ;;  %s2848_s13 = sadd.s32 4294967295, %s2276_s12   ;;  %s2276_s12 = sphi %s2349_s12, %s23_s12   ;;  %s2272_s11 = sphi %s2347_s11, %s2876_s11   ;;  %s2268_s10 = sphi %s2345_s10, %s2880_s10   ;;  %s2264_s9 = sphi %s2343_s9, %s2874_s9   ;;  %s2260_s30 = sphi %s2341_s30, %s2873_s30   ;;  %s2256_s29 = sphi %s2339_s29, %s2879_s29   ;;  %s2252_s28 = sphi %s2337_s28, %s2878_s28   ;;  %s2248_s27 = sphi %s2335_s27, %s2877_s27  }
   0xb   : > { %2855 = sst [smem:[#allocation15_spill]] %s2272_s11  ;;  %p174_p0 = scmp.ne.s32.totalorder %s2252_s28, %s2248_s27 }
   0xc   : > { %p2377_p1 = scmp.eq.s32.totalorder %s2848_s13, 0  ;;  %p1588_p2 = scmp.ge.s32.totalorder %s2276_s12, 1 }
   0xd   : > { %p280_p3 = scmp.lt.s32.totalorder %s2276_s12, 13  ;;  %s2278_s17 = smov [#allocation8]  }
   0xe   : > { %s2856_s14 = scalar_select %p2377_p1, 1, 0 }
   0xf   : > { %p2385_p4 = por %p2377_p1, %p174_p0  ;;  %p2389_p5 = pnand %p1588_p2, %p280_p3 }
  0x10   : > { %s295_s18 = sshll.u32 %s2278_s17, 4  ;;  %s2860_s6 = sld [smem:[#allocation20_spill]]  ;;  %s296_s18 = int_to_ptr.vmem [resolvable:$true] %s295_s18 }
  0x11   : > { %s2857_s15 = scalar_select %p2385_p4, 1, 0 }
  0x12   : > { %s2858_s16 = scalar_select %p2389_p5, 1, 0 }
  0x13   : > { %p1992_p6 = pneg %p2389_p5 }
  0x15   : > { %p2397_p7 = pnand %p1992_p6, %p2377_p1 }
  0x16   : > { %s2118_s22 = scalar_lea.hbm %s2860_s6, 2048 }
  0x17   : > { %p2119_p8 = scmp.ne.s32.totalorder %s2860_s6, %s2118_s22  ;;  %p2120_p9 = pneg %p2397_p7 }
  0x18   : > { %p2125_p12 = scmp.lt.u32.totalorder %s2118_s22, %s2860_s6 }
  0x19   : > { %p2121_p10 = pnand %p2120_p9, %p2119_p8 }
  0x1b   : > { %p2122_p11 = pneg %p2121_p10 }
  0x1d   : > { %p2127_p13 = pnand %p2125_p12, %p2122_p11 }
  0x1f   : > { %2130 = shalt.err (!%p2127_p13)
}
  0x20   : > { %s2131_s27 = scalar_lea.vmem %s296_s18, 2048  ;;  %p2139_p6 = scmp.lt.s32.totalorder %s296_s18, %s296_s18 }
  0x21   : > { %p2132_p0 = scmp.ne.s32.totalorder %s296_s18, %s2131_s27  ;;  %p2140_p1 = scmp.lt.s32.totalorder %s2131_s27, %s2131_s27 }
  0x23   : > { %p2134_p2 = pnand %p2132_p0, %p2120_p9  ;;  %p2141_p4 = por %p2140_p1, %p2139_p6 }
  0x25   : > { %p2135_p3 = pneg %p2134_p2 }
  0x27   : > { %p2142_p5 = pnand %p2141_p4, %p2135_p3 }
  0x29   : > { %2145 = shalt.err (!%p2142_p5)
}
  0x2a   : > { %s2279_s17 = smov 128   ;;  %s2280_s20 = smov 8  }
  0x2b   : > { %1995 = dma.hbm_to_vmem [thread:$0]  (!%p2397_p7), %s2860_s6, 2048, %s296_s18, [#allocation9], %s2279_s17, %s2279_s17, %s2280_s20  }
  0x2c   : > { %s32_s23 = sadd.s32 1, %s2268_s10  ;;  %s35_s24 = sadd.s32 1, %s2272_s11 }
  0x2d   : > { %p33_p1 = scmp.ge.s32.totalorder %s32_s23, 4  ;;  %s1584_s25 = sadd.s32 4294967295, %s2272_s11 }
  0x2e   : > { %s161_s26 = sadd.s32 1, %s2256_s29  ;;  %p153_p4 = scmp.gt.s32.totalorder %s1584_s25, 0 }
  0x2f   : > { %s2882_s23 = smov (%p33_p1, %s32_s23), 0  ;;  %s2884_s24 = smov (!%p33_p1, %s35_s24), %s2272_s11 }
  0x30   : > { %2861 = sst [smem:[#allocation16_spill]] %s2882_s23  ;;  %p168_p5 = scmp.ne.s32.totalorder %s2256_s29, %s2252_s28 }
  0x31   : > { %p37_p8 = scmp.ge.s32.totalorder %s2884_s24, 3  ;;  %p169_p9 = scmp.eq.s32.totalorder %s2276_s12, 0 }
  0x32   : > { %s2886_s25 = smov (!%p153_p4, %s1584_s25), 0  ;;  %p2001_p10 = scmp.lt.s32.totalorder %s2276_s12, 12 }
  0x33   : > { %s2888_s24 = smov (%p37_p8, %s2884_s24), 0  ;;  %p2429_p7 = por %p169_p9, %p168_p5 }
  0x34   : > { %2862 = sst [smem:[#allocation17_spill]] %s2888_s24  ;;  %s1585_s19 = sadd.s32 4294967295, %s2888_s24 }
  0x35   : > { %s353_s27 = sand.u32 1, %s2256_s29   ;;  %p156_p11 = scmp.gt.s32.totalorder %s1585_s19, 0 }
  0x36   : > { %s1591_s17 = sshll.u32 %s353_s27, 6  ;;  %s1666_s20 = sshll.u32 %s2886_s25, 10 }
  0x37   : > { %s2890_s19 = smov (!%p156_p11, %s1585_s19), 0  ;;  %s2864_s4 = sld [smem:[#allocation19_spill]] }
  0x38   : > { %s158_s6 = ssub.s32 %s2886_s25, %s2890_s19  ;;  %s357_s23 = scalar_lea.vmem [#allocation5], %s1591_s17 }
  0x39   : > { %s367_s11 = sshll.u32 %s357_s23, 4  ;;  %p159_p12 = scmp.eq.s32.totalorder %s158_s6, 0  ;;  %s2441_s11 = int_to_ptr.vmem [resolvable:$true] %s367_s11 }
  0x3a   : > { %p2447_p13 = pnand %p2001_p10, %p2429_p7  ;;  %s2454_s21 = scalar_lea.sflag [#allocation6], %s353_s27 }
  0x3c   : > { %p2148_p2 = pneg %p2447_p13 }
  0x3d   : > { %s2439_s13 = scalar_lea.hbm %s2864_s4, %s1666_s20  ;;  %s2151_s25 = scalar_lea.hbm %s2864_s4, 2048 }
  0x3e   : > { %s2452_s20 = scalar_select %p159_p12, %s2256_s29, %s161_s26  }
  0x3f   : > { %s2146_s22 = scalar_lea.hbm %s2439_s13, 1024  ;;  %p2152_p1 = scmp.lt.u32.totalorder %s2439_s13, %s2864_s4 }
  0x40   : > { %2866 = sst [smem:[#allocation18_spill]] %s2452_s20  ;;  %p2147_p0 = scmp.ne.s32.totalorder %s2439_s13, %s2146_s22 }
  0x41   : > { %p2153_p4 = scmp.lt.u32.totalorder %s2151_s25, %s2146_s22  ;;  %p2155_p8 = scmp.lt.u32.totalorder %s2146_s22, %s2439_s13 }
  0x42   : > { %p2149_p3 = pnand %p2148_p2, %p2147_p0 }
  0x43   : > { %p2154_p5 = por %p2153_p4, %p2152_p1 }
  0x44   : > { %p2150_p6 = pneg %p2149_p3 }
  0x45   : > { %p2156_p9 = por %p2155_p8, %p2154_p5 }
  0x47   : > { %p2157_p7 = pnand %p2156_p9, %p2150_p6 }
  0x49   : > { %2160 = shalt.err (!%p2157_p7)
}
  0x4a   : > { %s2161_s26 = scalar_lea.vmem %s2441_s11, 1024  ;;  %s2281_s27 = smov [#allocation5]  }
  0x4b   : > { %p2162_p10 = scmp.ne.s32.totalorder %s2441_s11, %s2161_s26  ;;  %s2166_s17 = sshll.u32 %s2281_s27, 4  ;;  %s2167_s17 = int_to_ptr.vmem [resolvable:$false] %s2166_s17 }
  0x4c   : > { %s2168_s6 = scalar_lea.vmem %s2167_s17, 2048  ;;  %p2169_p0 = scmp.lt.s32.totalorder %s2441_s11, %s2167_s17 }
  0x4d   : > { %p2164_p11 = pnand %p2162_p10, %p2148_p2  ;;  %p2170_p3 = scmp.lt.s32.totalorder %s2168_s6, %s2161_s26 }
  0x4f   : > { %p2165_p12 = pneg %p2164_p11  ;;  %p2171_p1 = por %p2170_p3, %p2169_p0 }
  0x51   : > { %p2172_p4 = pnand %p2171_p1, %p2165_p12 }
  0x53   : > { %2175 = shalt.err (!%p2172_p4)
}
  0x54   : > { %s2282_s22 = smov 64   ;;  %s2283_s23 = smov 4  }
  0x55   : > { %1999 = dma.hbm_to_vmem [thread:$0]  (!%p2447_p13), %s2439_s13, 1024, %s2441_s11, %s2454_s21, %s2282_s22, %s2282_s22, %s2283_s23  }
  0x56   : > { %p2867_p2 = scmp.ne.s32.totalorder %s2858_s16, 0 }
  0x57   : > { %s393_s25 = sand.u32 (!%p2867_p2), 1, %s2252_s28   ;;  %p2868_p6 = scmp.ne.s32.totalorder (!%p2867_p2), %s2857_s15, 0 }
  0x58   : > { %391 = sbr.rel (%p2867_p2) target bundleno = 1560 (0x618), region = 52  ;;  %s1596_s18 = sshll.u32 (!%p2867_p2), %s393_s25, 6 }
  0x59   : > { %s394_s19 = scalar_lea.sflag (!%p2867_p2), [#allocation6], %s393_s25  ;;  %s2485_s26 = scalar_lea.vmem (!%p2867_p2), [#allocation5], %s1596_s18 }
  0x5f   : > { %2235 = dma.done.wait (%p2868_p6), %s394_s19, 1024  }
  0x60   : > { %2237 = vsyncadd (%p2868_p6), %s394_s19, 4294966272  ;;  %p2869_p5 = scmp.ne.s32.totalorder %s2856_s14, 0 }
  0x62   : > { %2239 = dma.done.wait (%p2869_p5), [#allocation9], 2048  }
  0x63   : > { %2241 = vsyncadd (%p2869_p5), [#allocation9], 4294965248  ;;  %p458_p13 = scmp.eq.s32.totalorder %s2264_s9, 0  ;;  %s2497_s11 = sadd.s32 4294967295, %s2264_s9 }
  0x64   : > { %s2502_s24 = sshll.u32 %s2260_s30, 6  ;;  %p480_p7 = scmp.gt.s32.totalorder %s2497_s11, 0 }
  0x65   : > { %s459_s13 = scalar_select %p458_p13, %s2260_s30, 0 }
  0x66   : > { %s469_s15 = scalar_select %p458_p13, 0, %s2260_s30 }
  0x67   : > { %s1598_s16 = sshll.u32 %s459_s13, 3  ;;  %p1604_p10 = scmp.lt.s32.totalorder %s2497_s11, 1 }
  0x68   : > { %p461_p8 = scmp.lt.s32.totalorder %s1598_s16, 31  ;;  %s1600_s21 = sshll.u32 %s469_s15, 3 }
  0x69   : > { %p471_p9 = scmp.lt.s32.totalorder %s1600_s21, 31  ;;  %p1618_p11 = scmp.ne.s32.totalorder %s2264_s9, 0 }
  0x6a   : > { %s2892_s16 = smov (!%p461_p8, %s1598_s16), 31  ;;  %v520_v0 = vld [vmem:[%s2837_s2] sm:$0xf] (!%p1618_p11)  ;;  %vm534_vm0 = vcmask (!%p1618_p11), 1043456   ;;  %vm521_vm1 = vcmask (!%p1618_p11), 64512   ;;  %s607_s4 = sshra.s32 (!%p1618_p11), %s2502_s24, 4 }
  0x6b   : > { %s2894_s21 = smov (!%p471_p9, %s1600_s21), 31  ;;  %s1599_s14 = sshll.u32 %s2892_s16, 3  ;;  %1980 = vmatprep.subr.msk.bf16.mxu0 (!%p1618_p11), %vm534_vm0, %v520_v0  ;;  %1981 = vmatprep.subr.msk.bf16.mxu1 (!%p1618_p11), %vm534_vm0, %v520_v0  ;;  %v536_v3 = vsel (!%p1618_p11), %vm534_vm0, %v520_v0, 0 }
  0x6c   : > { %s464_s6 = scalar_lea.vmem %s2835_s0, %s1599_s14  ;;  %s1667_s22 = sshll.u32 %s2894_s21, 3  ;;  %1779 = vmatpush3.bf16.msra.mxu0 (!%p1618_p11), %v536_v3  ;;  %1955 = vmatpush3.bf16.msra.mxu1 (!%p1618_p11), %v536_v3 }
  0x6d   : > { %s2512_s18 = scalar_lea.vmem %s2836_s1, %s1667_s22  ;;  %507 = sbr.rel (%p1618_p11) target bundleno = 333 (0x14d), region = 64  ;;  %v508_v1 = vld [vmem:[%s464_s6] sm:$0xff] (!%p1618_p11)  ;;  %v509_v2 = vld [vmem:[%s464_s6 + $0x8] sm:$0xff] (!%p1618_p11)  ;;  %v510_v7 = vld [vmem:[%s464_s6 + $0x10] sm:$0xff] (!%p1618_p11) }
  0x6e   : > { %s481_s19 = scalar_select %p480_p7, %s2497_s11, 0 }
  0x6f   : > { %v516_v4 = vpack.c.bf16 (!%p1618_p11), %v509_v2, %v508_v1  ;;  %v512_v5 = vld [vmem:[%s464_s6 + $0x20] sm:$0xff] (!%p1618_p11)  ;;  %v513_v6 = vld [vmem:[%s464_s6 + $0x28] sm:$0xff] (!%p1618_p11)  ;;  %v511_v9 = vld [vmem:[%s464_s6 + $0x18] sm:$0xff] (!%p1618_p11)  ;;  %s1623_s10 = sshll.u32 (!%p1618_p11), %s607_s4, 3 }
  0x70   : > { %s2896_s19 = smov (!%p1604_p10, %s481_s19), 1  ;;  %v518_v8 = vpack.c.bf16 (!%p1618_p11), %v513_v6, %v512_v5  ;;  %v514_v10 = vld [vmem:[%s464_s6 + $0x30] sm:$0xff] (!%p1618_p11)  ;;  %v515_v11 = vld [vmem:[%s464_s6 + $0x38] sm:$0xff] (!%p1618_p11)  ;;  %v517_v12 = vpack.c.bf16 (!%p1618_p11), %v511_v9, %v510_v7  ;;  %s610_s20 = scalar_lea.vmem (!%p1618_p11), [#allocation2], %s1623_s10 }
  0x71   : > { %s1670_s13 = sshll.u32 %s2896_s19, 6  ;;  %s498_s16 = scalar_lea.vmem %s2840_s5, %s2896_s19  ;;  %1780 = vmatprep.mubr.msk.bf16.mxu0 (!%p1618_p11), %vm521_vm1, %v516_v4  ;;  %v519_v13 = vpack.c.bf16 (!%p1618_p11), %v515_v11, %v514_v10 }
  0x72   : > { %s2525_s14 = scalar_lea.vmem %s2838_s3, %s1670_s13  ;;  %1784 = vmatprep.mubr.msk.bf16.mxu1 (!%p1618_p11), %vm521_vm1, %v518_v8  ;;  %1781 = vmatmul.mubr.msk.bf16.vlgmr.msra.gmra.mrb[0].mxu0 (!%p1618_p11), %vm521_vm1, %v517_v12 }
  0x73   : > { %1785 = vmatmul.mubr.msk.bf16.vlgmr.msra.gmra.mrb[0].mxu1 (!%p1618_p11), %vm521_vm1, %v519_v13 }
 0x145   : > { %v1782_v14 = vpop.f32.mrb[0].mxu0 }
 0x146   : > { %v1786_v15 = vpop.f32.mrb[0].mxu1  ;;  %v572_v16 = vpop.f32.mrb[1].mxu0 }
 0x147   : > { %v588_v17 = vpop.f32.mrb[1].mxu1  ;;  %v1783_v18 = vpop.f32.mrb[2].mxu0 }
 0x148   : > { %v1787_v19 = vpop.f32.mrb[2].mxu1  ;;  %v604_v20 = vpack.c.bf16 %v1783_v18, %v1782_v14  ;;  %v575_v22 = vpop.f32.mrb[3].mxu0 }
 0x149   : > { %v606_v21 = vpack.c.bf16 %v1787_v19, %v1786_v15  ;;  %v591_v23 = vpop.f32.mrb[3].mxu1  ;;  %v603_v24 = vpack.c.bf16 %v575_v22, %v572_v16 }
 0x14a   : > { %v605_v25 = vpack.c.bf16 %v591_v23, %v588_v17  ;;  %612 = vst [vmem:[%s610_s20 + $0x8] sm:$0xff] %v604_v20 }
 0x14b   : > { %614 = vst [vmem:[%s610_s20 + $0x18] sm:$0xff] %v606_v21  ;;  %611 = vst [vmem:[%s610_s20] sm:$0xff] %v603_v24 }
 0x14c   : > { %613 = vst [vmem:[%s610_s20 + $0x10] sm:$0xff] %v605_v25 }
 0x14d PF: > { %p1624_p12 = scmp.le.s32.totalorder %s2264_s9, 0 }
 0x14e   : > { %v2538_v26 = vld [vmem:[%s2512_s18] sm:$0xff] (!%p1624_p12)  ;;  %v2541_v27 = vld [vmem:[%s2512_s18 + $0x8] sm:$0xff] (!%p1624_p12)  ;;  %v2544_v28 = vld [vmem:[%s2512_s18 + $0x10] sm:$0xff] (!%p1624_p12)  ;;  %p1625_p0 = scmp.ne.s32.totalorder (!%p1624_p12), %s2264_s9, 1 }
 0x14f   : > { %618 = sbr.rel (%p1624_p12) target bundleno = 1535 (0x5ff), region = 68  ;;  %v2547_v29 = vld [vmem:[%s2512_s18 + $0x18] sm:$0xff] (!%p1624_p12)  ;;  %v2550_v30 = vld [vmem:[%s2512_s18 + $0x20] sm:$0xff] (!%p1624_p12)  ;;  %v2553_v31 = vld [vmem:[%s2512_s18 + $0x28] sm:$0xff] (!%p1624_p12) }
 0x150   : > { %v2556_v32 = vld [vmem:[%s2512_s18 + $0x30] sm:$0xff] (!%p1624_p12)  ;;  %v2559_v33 = vld [vmem:[%s2512_s18 + $0x38] sm:$0xff] (!%p1624_p12) }
 0x156   : > { %630 = sbr.rel (%p1625_p0) target bundleno = 514 (0x202), region = 72  ;;  %v635_v34 = vunpack.c.l.bf16 (!%p1625_p0), %v2544_v28  ;;  %v636_v35 = vunpack.c.h.bf16 (!%p1625_p0), %v2544_v28  ;;  %v631_v36 = vunpack.c.l.bf16 (!%p1625_p0), %v2538_v26  ;;  %v632_v37 = vunpack.c.h.bf16 (!%p1625_p0), %v2538_v26  ;;  %s703_s17 = scalar_lea.vmem (!%p1625_p0), [#allocation3], %s2502_s24 }
 0x157   : > { %v637_v38 = vunpack.c.l.bf16 (!%p1625_p0), %v2547_v29  ;;  %v638_v39 = vunpack.c.h.bf16 (!%p1625_p0), %v2547_v29  ;;  %v633_v40 = vunpack.c.l.bf16 (!%p1625_p0), %v2541_v27  ;;  %v634_v41 = vunpack.c.h.bf16 (!%p1625_p0), %v2541_v27 }
 0x158   : > { %v653_v42 = vadd.f32 (!%p1625_p0), %v636_v35, %v635_v34  ;;  %v647_v43 = vadd.f32 (!%p1625_p0), %v632_v37, %v631_v36  ;;  %v641_v44 = vunpack.c.l.bf16 (!%p1625_p0), %v2553_v31  ;;  %v642_v45 = vunpack.c.h.bf16 (!%p1625_p0), %v2553_v31 }
 0x159   : > { %v656_v46 = vadd.f32 (!%p1625_p0), %v638_v39, %v637_v38  ;;  %v650_v47 = vadd.f32 (!%p1625_p0), %v634_v41, %v633_v40  ;;  %v639_v48 = vunpack.c.l.bf16 (!%p1625_p0), %v2550_v30  ;;  %v640_v49 = vunpack.c.h.bf16 (!%p1625_p0), %v2550_v30 }
 0x15a   : > { %654 = vadd.xlane.f32.xlu1 (!%p1625_p0), %v653_v42  ;;  %648 = vadd.xlane.f32.xlu0 (!%p1625_p0), %v647_v43  ;;  %v662_v50 = vadd.f32 (!%p1625_p0), %v642_v45, %v641_v44  ;;  %v645_v51 = vunpack.c.l.bf16 (!%p1625_p0), %v2559_v33  ;;  %v646_v53 = vunpack.c.h.bf16 (!%p1625_p0), %v2559_v33  ;;  %v643_v54 = vunpack.c.l.bf16 (!%p1625_p0), %v2556_v32 }
 0x15b   : > { %v659_v52 = vadd.f32 (!%p1625_p0), %v640_v49, %v639_v48  ;;  %v644_v55 = vunpack.c.h.bf16 (!%p1625_p0), %v2556_v32  ;;  %vm704_vm2 = vcmask (!%p1625_p0), 7168  }
 0x15c   : > { %v668_v56 = vadd.f32 (!%p1625_p0), %v646_v53, %v645_v51 }
 0x15d   : > { %v665_v57 = vadd.f32 %v644_v55, %v643_v54 }
 0x15e   : > { %657 = vadd.xlane.f32.xlu1 %v656_v46  ;;  %651 = vadd.xlane.f32.xlu0 %v650_v47 }
 0x162   : > { %663 = vadd.xlane.f32.xlu1 %v662_v50  ;;  %660 = vadd.xlane.f32.xlu0 %v659_v52 }
 0x166   : > { %669 = vadd.xlane.f32.xlu1 %v668_v56  ;;  %666 = vadd.xlane.f32.xlu0 %v665_v57 }
 0x1e7   : > { %v655_v58 = vpop.xlane.xlu1 %654  ;;  %v649_v59 = vpop.xlane.xlu0 %648 }
 0x1e8   : > { %2080 = vrcp.f32 %v655_v58  ;;  %vm673_vm3 = vcmp.gt.f32.partialorder %v655_v58, 0.0  ;;  %vm671_vm4 = vcmp.gt.f32.partialorder %v649_v59, 0.0 }
 0x1e9   : > { %2082 = vrcp.f32 %v649_v59 }
 0x1eb   : > { %v658_v60 = vpop.xlane.xlu1 %657  ;;  %v652_v61 = vpop.xlane.xlu0 %651 }
 0x1ec   : > { %2084 = vrcp.f32 %v658_v60  ;;  %vm674_vm5 = vcmp.gt.f32.partialorder %v658_v60, 0.0  ;;  %vm672_vm6 = vcmp.gt.f32.partialorder %v652_v61, 0.0 }
 0x1ed   : > { %2086 = vrcp.f32 %v652_v61 }
 0x1ef   : > { %v664_v62 = vpop.xlane.xlu1 %663  ;;  %v661_v63 = vpop.xlane.xlu0 %660 }
 0x1f0   : > { %2088 = vrcp.f32 %v664_v62  ;;  %vm676_vm7 = vcmp.gt.f32.partialorder %v664_v62, 0.0  ;;  %vm675_vm8 = vcmp.gt.f32.partialorder %v661_v63, 0.0 }
 0x1f1   : > { %2090 = vrcp.f32 %v661_v63 }
 0x1f2   : > { %v2081_v0 = vpop.eup %2080 }
 0x1f3   : > { %v2083_v1 = vpop.eup %2082  ;;  %v697_v2 = vsel %vm673_vm3, %v2081_v0, 0.0  ;;  %v670_v3 = vpop.xlane.xlu1 %669 }
 0x1f4   : > { %v667_v4 = vpop.xlane.xlu0 %666  ;;  %707 = vst.msk [vmem:[%s703_s17 + $0x10] sm:$0xff] %vm704_vm2, %v697_v2  ;;  %v695_v5 = vsel %vm671_vm4, %v2083_v1, 0.0  ;;  %2092 = vrcp.f32 %v670_v3  ;;  %vm678_vm9 = vcmp.gt.f32.partialorder %v670_v3, 0.0 }
 0x1f5   : > { %705 = vst.msk [vmem:[%s703_s17] sm:$0xff] %vm704_vm2, %v695_v5  ;;  %2094 = vrcp.f32 %v667_v4  ;;  %vm677_vm10 = vcmp.gt.f32.partialorder %v667_v4, 0.0 }
 0x1f6   : > { %v2085_v6 = vpop.eup %2084 }
 0x1f7   : > { %v2087_v7 = vpop.eup %2086  ;;  %v698_v8 = vsel %vm674_vm5, %v2085_v6, 0.0 }
 0x1f8   : > { %708 = vst.msk [vmem:[%s703_s17 + $0x18] sm:$0xff] %vm704_vm2, %v698_v8  ;;  %v696_v9 = vsel %vm672_vm6, %v2087_v7, 0.0 }
 0x1f9   : > { %706 = vst.msk [vmem:[%s703_s17 + $0x8] sm:$0xff] %vm704_vm2, %v696_v9 }
 0x1fa   : > { %v2089_v10 = vpop.eup %2088 }
 0x1fb   : > { %v2091_v11 = vpop.eup %2090  ;;  %v700_v12 = vsel %vm676_vm7, %v2089_v10, 0.0 }
 0x1fc   : > { %710 = vst.msk [vmem:[%s703_s17 + $0x28] sm:$0xff] %vm704_vm2, %v700_v12  ;;  %v699_v13 = vsel %vm675_vm8, %v2091_v11, 0.0 }
 0x1fd   : > { %709 = vst.msk [vmem:[%s703_s17 + $0x20] sm:$0xff] %vm704_vm2, %v699_v13 }
 0x1fe   : > { %v2093_v14 = vpop.eup %2092 }
 0x1ff   : > { %v2095_v15 = vpop.eup %2094  ;;  %v702_v16 = vsel %vm678_vm9, %v2093_v14, 0.0 }
 0x200   : > { %712 = vst.msk [vmem:[%s703_s17 + $0x38] sm:$0xff] %vm704_vm2, %v702_v16  ;;  %v701_v17 = vsel %vm677_vm10, %v2095_v15, 0.0 }
 0x201   : > { %711 = vst.msk [vmem:[%s703_s17 + $0x30] sm:$0xff] %vm704_vm2, %v701_v17 }
 0x202 PF: > { %s723_s6 = sand.u32 1, %s2497_s11  ;;  %v1630_v18 = vcombine.high %v2538_v26, %v2541_v27  ;;  %s2591_s23 = scalar_lea.vmem [#allocation3], %s2502_s24  ;;  %v2284_v24 = vmov 0   ;;  %v2098_v40 = vld [vmem:[%s2485_s26] sm:$0xff]   ;;  %v2100_v42 = vld [vmem:[%s2485_s26 + $0x8] sm:$0xff]   ;;  %v2102_v46 = vld [vmem:[%s2485_s26 + $0x10] sm:$0xff]   ;;  %v1629_v57 = vcombine.low %v2538_v26, %v2541_v27  ;;  %v1632_v58 = vcombine.high %v2544_v28, %v2547_v29 }
 0x203   : > { %s1673_s22 = sshll.u32 %s723_s6, 7  ;;  %2096 = vset.pattern.permute.xlu0 %v2284_v24  ;;  %2097 = vset.pattern.permute.xlu1 %v2284_v24  ;;  %v2104_v49 = vld [vmem:[%s2485_s26 + $0x18] sm:$0xff]   ;;  %v2632_v59 = vld [vmem:[%s2525_s14 + $0x8] sm:$0xff]   ;;  %v2637_v60 = vld [vmem:[%s2525_s14 + $0x10] sm:$0xff]   ;;  %v1631_v61 = vcombine.low %v2544_v28, %v2547_v29  ;;  %v1634_v26 = vcombine.high %v2550_v30, %v2553_v31  ;;  %v1633_v28 = vcombine.low %v2550_v30, %v2553_v31  ;;  %s897_s11 = sshra.s32 %s2502_s24, 4 }
 0x204   : > { %816 = vmatprep.mubr.bf16.mxu0 %v1630_v18  ;;  %s2595_s25 = scalar_lea.vmem [#allocation2], %s1673_s22  ;;  %1788 = vmatprep.subr.bf16.mxu1 %v2098_v40  ;;  %v2624_v56 = vld [vmem:[%s2525_s14] sm:$0xff]   ;;  %v2646_v27 = vld [vmem:[%s2525_s14 + $0x18] sm:$0xff]   ;;  %v1636_v29 = vcombine.high %v2556_v32, %v2559_v33  ;;  %v1635_v62 = vcombine.low %v2556_v32, %v2559_v33  ;;  %v2108_v30 = vld [vmem:[%s2485_s26 + $0x28] sm:$0xff]   ;;  %s2681_s18 = sshll.u32 %s897_s11, 3 }
 0x205   : > { %v736_v21 = vld [vmem:[%s2595_s25 + $0x40] sm:$0xff]  ;;  %v737_v23 = vld [vmem:[%s2595_s25 + $0x48] sm:$0xff]  ;;  %v738_v36 = vld [vmem:[%s2595_s25 + $0x50] sm:$0xff]  ;;  %1789 = vmatpush3.bf16.msra.mxu1 %v2098_v40  ;;  %s2687_s13 = scalar_lea.vmem %s2595_s25, %s2681_s18 [#allocation2]  ;;  %p1658_p3 = scmp.ne.s32.totalorder %s2264_s9, 2 }
 0x206   : > { %v728_v22 = vld [vmem:[%s2595_s25] sm:$0xff]  ;;  %1680 = vmatprep.subr.bf16.mxu0 %v736_v21  ;;  %v729_v34 = vld [vmem:[%s2595_s25 + $0x8] sm:$0xff]  ;;  %v730_v37 = vld [vmem:[%s2595_s25 + $0x10] sm:$0xff]  ;;  %1790 = vmatprep.subr.bf16.mxu1 %v2100_v42  ;;  %p1659_p1 = scmp.ne.s32.totalorder (!%p1658_p3), %s2260_s30, 0 }
 0x207   : > { %1681 = vmatpush3.bf16.msra.mxu0 %v728_v22  ;;  %v739_v41 = vld [vmem:[%s2595_s25 + $0x58] sm:$0xff]  ;;  %v740_v47 = vld [vmem:[%s2595_s25 + $0x60] sm:$0xff]  ;;  %v741_v50 = vld [vmem:[%s2595_s25 + $0x68] sm:$0xff] }
 0x208   : > { %v714_v19 = vld [vmem:[%s2591_s23] sm:$0xff]  ;;  %v716_v20 = vld [vmem:[%s2591_s23 + $0x10] sm:$0xff]  ;;  %v715_v25 = vld [vmem:[%s2591_s23 + $0x8] sm:$0xff]  ;;  %1682 = vmatprep.subr.bf16.mxu0 %v737_v23 }
 0x209   : > { %851 = vperm.xlu0 %2096, %v714_v19   ;;  %861 = vperm.xlu1 %2097, %v716_v20   ;;  %v717_v35 = vld [vmem:[%s2591_s23 + $0x18] sm:$0xff]  ;;  %v718_v38 = vld [vmem:[%s2591_s23 + $0x20] sm:$0xff]  ;;  %v719_v39 = vld [vmem:[%s2591_s23 + $0x28] sm:$0xff] }
 0x20a   : > { %v731_v43 = vld [vmem:[%s2595_s25 + $0x18] sm:$0xff]  ;;  %v720_v44 = vld [vmem:[%s2591_s23 + $0x30] sm:$0xff]  ;;  %v732_v48 = vld [vmem:[%s2595_s25 + $0x20] sm:$0xff]  ;;  %1791 = vmatpush3.bf16.msra.mxu1 %v2100_v42 }
 0x20b   : > { %1683 = vmatpush3.bf16.msra.mxu0 %v729_v34  ;;  %v721_v45 = vld [vmem:[%s2591_s23 + $0x38] sm:$0xff]  ;;  %1792 = vmatprep.subr.bf16.mxu1 %v2102_v46  ;;  %v733_v51 = vld [vmem:[%s2595_s25 + $0x28] sm:$0xff]  ;;  %v742_v52 = vld [vmem:[%s2595_s25 + $0x70] sm:$0xff] }
 0x20c   : > { %1684 = vmatprep.subr.bf16.mxu0 %v738_v36  ;;  %v734_v53 = vld [vmem:[%s2595_s25 + $0x30] sm:$0xff]  ;;  %v743_v54 = vld [vmem:[%s2595_s25 + $0x78] sm:$0xff]  ;;  %v2106_v63 = vld [vmem:[%s2485_s26 + $0x20] sm:$0xff]  }
 0x20d   : > { %856 = vperm.xlu0 %2096, %v715_v25   ;;  %866 = vperm.xlu1 %2097, %v717_v35   ;;  %v735_v55 = vld [vmem:[%s2595_s25 + $0x38] sm:$0xff]  ;;  %v2659_v0 = vld [vmem:[%s2525_s14 + $0x20] sm:$0xff]   ;;  %v2665_v31 = vld [vmem:[%s2525_s14 + $0x28] sm:$0xff]  }
 0x20e   : > { %1793 = vmatpush3.bf16.msra.mxu1 %v2102_v46  ;;  %v2110_v32 = vld [vmem:[%s2485_s26 + $0x30] sm:$0xff]   ;;  %v2112_v1 = vld [vmem:[%s2485_s26 + $0x38] sm:$0xff]   ;;  %v902_v4 = vld [vmem:[%s2687_s13 + $0x8] sm:$0xff]  ;;  %s724_s26 = sand.u32 1, %s2264_s9 }
 0x20f   : > { %1685 = vmatpush3.bf16.msra.mxu0 %v730_v37  ;;  %1794 = vmatprep.subr.bf16.mxu1 %v2104_v49  ;;  %v2671_v33 = vld [vmem:[%s2525_s14 + $0x30] sm:$0xff]   ;;  %v2677_v2 = vld [vmem:[%s2525_s14 + $0x38] sm:$0xff]   ;;  %v901_v3 = vld [vmem:[%s2687_s13] sm:$0xff]  ;;  %s1674_s15 = sshll.u32 %s724_s26, 7 }
 0x210   : > { %1686 = vmatprep.subr.bf16.mxu0 %v739_v41  ;;  %s1188_s27 = scalar_lea.vmem [#allocation2], %s1674_s15 }
 0x211   : > { %871 = vperm.xlu0 %2096, %v718_v38   ;;  %876 = vperm.xlu1 %2097, %v719_v39   ;;  %s1190_s4 = scalar_lea.vmem %s1188_s27, %s2681_s18 [#allocation2] }
 0x212   : > { %1795 = vmatpush3.bf16.msra.mxu1 %v2104_v49 }
 0x213   : > { %1687 = vmatpush3.bf16.msra.mxu0 %v731_v43  ;;  %1796 = vmatprep.subr.bf16.mxu1 %v2106_v63 }
 0x214   : > { %1688 = vmatprep.subr.bf16.mxu0 %v740_v47 }
 0x215   : > { %881 = vperm.xlu0 %2096, %v720_v44   ;;  %886 = vperm.xlu1 %2097, %v721_v45  }
 0x216   : > { %1797 = vmatpush3.bf16.msra.mxu1 %v2106_v63 }
 0x217   : > { %1689 = vmatpush3.bf16.msra.mxu0 %v732_v48  ;;  %1798 = vmatprep.subr.bf16.mxu1 %v2108_v30 }
 0x218   : > { %1690 = vmatprep.subr.bf16.mxu0 %v741_v50 }
 0x21a   : > { %1799 = vmatpush3.bf16.msra.mxu1 %v2108_v30 }
 0x21b   : > { %1691 = vmatpush3.bf16.msra.mxu0 %v733_v51  ;;  %1800 = vmatprep.subr.bf16.mxu1 %v2110_v32 }
 0x21c   : > { %1692 = vmatprep.subr.bf16.mxu0 %v742_v52 }
 0x21e   : > { %1801 = vmatpush3.bf16.msra.mxu1 %v2110_v32 }
 0x21f   : > { %1693 = vmatpush3.bf16.msra.mxu0 %v734_v53  ;;  %1802 = vmatprep.subr.bf16.mxu1 %v2112_v1 }
 0x220   : > { %1694 = vmatprep.subr.bf16.mxu0 %v743_v54 }
 0x222   : > { %1803 = vmatpush3.bf16.msra.mxu1 %v2112_v1 }
 0x223   : > { %1695 = vmatpush3.bf16.msra.mxu0 %v735_v55  ;;  %1956 = vmatprep.subr.bf16.mxu1 %v2624_v56 }
 0x224   : > { %1812 = vmatprep.subr.bf16.mxu0 %v2624_v56 }
 0x226   : > { %817 = vmatmul.mubr.bf16.vlgmr.msra.gmra.mrb[0].mxu0 %v1629_v57  ;;  %v903_v57 = vld [vmem:[%s2687_s13 + $0x10] sm:$0xff] }
 0x227   : > { %824 = vmatprep.mubr.bf16.mxu0 %v1632_v58  ;;  %1813 = vmatpush3.bf16.msra.mxu0 %v2624_v56  ;;  %v904_v58 = vld [vmem:[%s2687_s13 + $0x18] sm:$0xff] }
 0x228   : > { %1814 = vmatprep.subr.bf16.mxu0 %v2632_v59 }
 0x22b   : > { %1815 = vmatpush3.bf16.msra.mxu0 %v2632_v59 }
 0x22c   : > { %1816 = vmatprep.subr.bf16.mxu0 %v2637_v60 }
 0x22e   : > { %825 = vmatmul.mubr.bf16.gmra.mrb[4].mxu0 %v1631_v61 }
 0x22f   : > { %832 = vmatprep.mubr.bf16.mxu0 %v1634_v26  ;;  %1817 = vmatpush3.bf16.msra.mxu0 %v2637_v60 }
 0x230   : > { %1818 = vmatprep.subr.bf16.mxu0 %v2646_v27 }
 0x233   : > { %1819 = vmatpush3.bf16.msra.mxu0 %v2646_v27 }
 0x234   : > { %1820 = vmatprep.subr.bf16.mxu0 %v2659_v0 }
 0x236   : > { %833 = vmatmul.mubr.bf16.gmra.mrb[8].mxu0 %v1633_v28 }
 0x237   : > { %840 = vmatprep.mubr.bf16.mxu0 %v1636_v29  ;;  %1821 = vmatpush3.bf16.msra.mxu0 %v2659_v0 }
 0x238   : > { %1822 = vmatprep.subr.bf16.mxu0 %v2665_v31 }
 0x23b   : > { %1823 = vmatpush3.bf16.msra.mxu0 %v2665_v31 }
 0x23c   : > { %1824 = vmatprep.subr.bf16.mxu0 %v2671_v33 }
 0x23e   : > { %841 = vmatmul.mubr.bf16.gmra.mrb[12].mxu0 %v1635_v62  ;;  %v1654_v62 = vld [vmem:[%s498_s16] ss:$0 sm:$0xff] }
 0x23f   : > { %1825 = vmatpush3.bf16.msra.mxu0 %v2671_v33  ;;  %1828 = vmatprep.mubr.bf16.mxu0 %v901_v3 }
 0x240   : > { %1826 = vmatprep.subr.bf16.mxu0 %v2677_v2 }
 0x243   : > { %1827 = vmatpush3.bf16.msra.mxu0 %v2677_v2 }
 0x246   : > { %1829 = vmatmul.mubr.bf16.vlgmr.msra.gmra.mrb[16].mxu0 %v902_v4 }
 0x288   : > { %v852_v5 = vpop.permute.xlu0 %851  ;;  %v862_v15 = vpop.permute.xlu1 %861 }
 0x28c   : > { %v857_v12 = vpop.permute.xlu0 %856  ;;  %v867_v23 = vpop.permute.xlu1 %866 }
 0x290   : > { %v872_v41 = vpop.permute.xlu0 %871  ;;  %v877_v42 = vpop.permute.xlu1 %876 }
 0x294   : > { %v882_v52 = vpop.permute.xlu0 %881  ;;  %v887_v53 = vpop.permute.xlu1 %886 }
 0x2f9   : > { %v1696_v6 = vpop.f32.mrb[0].mxu0 }
 0x2fa   : > { %v1697_v7 = vpop.f32.mrb[1].mxu0 }
 0x2fb   : > { %v1698_v8 = vadd.f32 %v1697_v7, %v1696_v6  ;;  %v1699_v9 = vpop.f32.mrb[2].mxu0 }
 0x2fc   : > { %v1700_v10 = vpop.f32.mrb[3].mxu0 }
 0x2fd   : > { %v1701_v11 = vadd.f32 %v1700_v10, %v1699_v9  ;;  %v889_v13 = vmul.f32 %v1698_v8, %v852_v5 }
 0x2ff   : > { %v890_v14 = vmul.f32 %v1701_v11, %v857_v12 }
 0x301   : > { %v1702_v16 = vpop.f32.mrb[4].mxu0  ;;  %v921_v17 = vpack.c.bf16 %v890_v14, %v889_v13 }
 0x302   : > { %v1703_v18 = vpop.f32.mrb[5].mxu0 }
 0x303   : > { %v1704_v19 = vadd.f32 %v1703_v18, %v1702_v16  ;;  %v1705_v20 = vpop.f32.mrb[6].mxu0  ;;  %1804 = vmatprep.mubr.bf16.mxu1 %v921_v17  ;;  %v1199_v16 = vlaneseq (!%p1658_p3)  ;;  %v1208_v18 = vstv (!%p1658_p3), %s2502_s24 }
 0x304   : > { %v1706_v21 = vpop.f32.mrb[7].mxu0 }
 0x305   : > { %v1707_v22 = vadd.f32 %v1706_v21, %v1705_v20  ;;  %v891_v24 = vmul.f32 %v1704_v19, %v862_v15  ;;  %v1200_v17 = vshrl.u32 (!%p1658_p3), %v1199_v16, 7 }
 0x307   : > { %v892_v25 = vmul.f32 %v1707_v22, %v867_v23  ;;  %v1201_v19 = vadd.s32 (!%p1658_p3), 8, %v1200_v17  ;;  %v1202_v20 = vadd.s32 (!%p1658_p3), 16, %v1200_v17  ;;  %v1203_v21 = vadd.s32 (!%p1658_p3), 24, %v1200_v17 }
 0x308   : > { %v1204_v22 = vadd.s32 (!%p1658_p3), 32, %v1200_v17  ;;  %v1205_v23 = vadd.s32 (!%p1658_p3), 40, %v1200_v17 }
 0x309   : > { %v1708_v34 = vpop.f32.mrb[8].mxu0  ;;  %v922_v35 = vpack.c.bf16 %v892_v25, %v891_v24  ;;  %v1209_v24 = vadd.s32 (!%p1658_p3), %v1208_v18, %v1200_v17  ;;  %v1210_v25 = vadd.s32 (!%p1658_p3), %v1208_v18, %v1201_v19 }
 0x30a   : > { %v1709_v36 = vpop.f32.mrb[9].mxu0 }
 0x30b   : > { %v1710_v37 = vadd.f32 %v1709_v36, %v1708_v34  ;;  %v1711_v38 = vpop.f32.mrb[10].mxu0  ;;  %1805 = vmatmul.mubr.bf16.vlgmr.msra.gmra.mrb[0].mxu1 %v922_v35  ;;  %v1211_v34 = vadd.s32 (!%p1658_p3), %v1208_v18, %v1202_v20  ;;  %v1212_v35 = vadd.s32 (!%p1658_p3), %v1208_v18, %v1203_v21  ;;  %v1206_v36 = vadd.s32 (!%p1658_p3), 48, %v1200_v17 }
 0x30c   : > { %1964 = vmatpush3.bf16.msra.mxu1 %v2624_v56  ;;  %v1712_v39 = vpop.f32.mrb[11].mxu0  ;;  %vm1217_vm11 = vcmp.lt.s32.totalorder (!%p1658_p3), %v1209_v24, 200  ;;  %vm1218_vm12 = vcmp.lt.s32.totalorder (!%p1658_p3), %v1210_v25, 200 }
 0x30d   : > { %v1713_v40 = vadd.f32 %v1712_v39, %v1711_v38  ;;  %1957 = vmatprep.subr.bf16.mxu1 %v2632_v59  ;;  %v893_v43 = vmul.f32 %v1710_v37, %v872_v41  ;;  %v1213_v37 = vadd.s32 (!%p1658_p3), %v1208_v18, %v1204_v22  ;;  %vm1219_vm13 = vcmp.lt.s32.totalorder (!%p1658_p3), %v1211_v34, 200 }
 0x30e   : > { %v1207_v38 = vadd.s32 (!%p1658_p3), 56, %v1200_v17  ;;  %v1214_v39 = vadd.s32 (!%p1658_p3), %v1208_v18, %v1205_v23  ;;  %vm1220_vm14 = vcmp.lt.s32.totalorder (!%p1658_p3), %v1212_v35, 200 }
 0x30f   : > { %v894_v44 = vmul.f32 %v1713_v40, %v877_v42  ;;  %vm1221_vm15 = vcmp.lt.s32.totalorder (!%p1658_p3), %v1213_v37, 200 }
 0x310   : > { %1965 = vmatpush3.bf16.msra.mxu1 %v2632_v59  ;;  %vm1222_vm0 = vcmp.lt.s32.totalorder (!%p1658_p3), %v1214_v39, 200 }
 0x311   : > { %v1714_v45 = vpop.f32.mrb[12].mxu0  ;;  %1958 = vmatprep.subr.bf16.mxu1 %v2637_v60  ;;  %v923_v46 = vpack.c.bf16 %v894_v44, %v893_v43  ;;  %v1215_v43 = vadd.s32 (!%p1658_p3), %v1208_v18, %v1206_v36 }
 0x312   : > { %v1715_v47 = vpop.f32.mrb[13].mxu0 }
 0x313   : > { %v1716_v48 = vadd.f32 %v1715_v47, %v1714_v45  ;;  %v1717_v49 = vpop.f32.mrb[14].mxu0  ;;  %1808 = vmatprep.mubr.bf16.mxu1 %v923_v46  ;;  %v1216_v46 = vadd.s32 (!%p1658_p3), %v1208_v18, %v1207_v38  ;;  %vm1223_vm1 = vcmp.lt.s32.totalorder (!%p1658_p3), %v1215_v43, 200 }
 0x314   : > { %1966 = vmatpush3.bf16.msra.mxu1 %v2637_v60  ;;  %v1718_v50 = vpop.f32.mrb[15].mxu0 }
 0x315   : > { %v1719_v51 = vadd.f32 %v1718_v50, %v1717_v49  ;;  %1959 = vmatprep.subr.bf16.mxu1 %v2646_v27  ;;  %v895_v54 = vmul.f32 %v1716_v48, %v882_v52  ;;  %vm1224_vm2 = vcmp.lt.s32.totalorder (!%p1658_p3), %v1216_v46, 200 }
 0x317   : > { %v896_v55 = vmul.f32 %v1719_v51, %v887_v53 }
 0x318   : > { %1967 = vmatpush3.bf16.msra.mxu1 %v2646_v27 }
 0x319   : > { %1960 = vmatprep.subr.bf16.mxu1 %v2659_v0  ;;  %v924_v56 = vpack.c.bf16 %v896_v55, %v895_v54  ;;  %v1830_v59 = vpop.f32.mrb[16].mxu0 }
 0x31a   : > { %v1136_v60 = vpop.f32.mrb[17].mxu0 }
 0x31b   : > { %1809 = vmatmul.mubr.bf16.gmra.mrb[4].mxu1 %v924_v56  ;;  %v1831_v61 = vpop.f32.mrb[18].mxu0 }
 0x31c   : > { %1968 = vmatpush3.bf16.msra.mxu1 %v2659_v0  ;;  %1832 = vmatprep.mubr.bf16.mxu1 %v903_v57  ;;  %v1139_v26 = vpop.f32.mrb[19].mxu0 }
 0x31d   : > { %1961 = vmatprep.subr.bf16.mxu1 %v2665_v31 }
 0x320   : > { %1969 = vmatpush3.bf16.msra.mxu1 %v2665_v31 }
 0x321   : > { %1962 = vmatprep.subr.bf16.mxu1 %v2671_v33 }
 0x324   : > { %1970 = vmatpush3.bf16.msra.mxu1 %v2671_v33 }
 0x325   : > { %1963 = vmatprep.subr.bf16.mxu1 %v2677_v2 }
 0x328   : > { %1971 = vmatpush3.bf16.msra.mxu1 %v2677_v2 }
 0x32b   : > { %1833 = vmatmul.mubr.bf16.vlgmr.msra.gmra.mrb[4].mxu1 %v904_v58 }
 0x3de   : > { %v1806_v27 = vpop.f32.mrb[0].mxu1 }
 0x3df   : > { %v1145_v28 = vadd.f32 %v1830_v59, %v1806_v27  ;;  %v1023_v29 = vpop.f32.mrb[1].mxu1 }
 0x3e0   : > { %v1137_v63 = vadd.f32 %v1136_v60, %v1023_v29  ;;  %v1807_v0 = vpop.f32.mrb[2].mxu1 }
 0x3e1   : > { %v1148_v30 = vadd.f32 %v1831_v61, %v1807_v0  ;;  %v1026_v31 = vpop.f32.mrb[3].mxu1  ;;  %v1176_v33 = vadd.f32 %v1654_v62, %v1145_v28 }
 0x3e2   : > { %v1140_v32 = vadd.f32 %v1139_v26, %v1026_v31  ;;  %v1174_v2 = vadd.f32 %v1654_v62, %v1137_v63 }
 0x3e3   : > { %v1177_v1 = vadd.f32 %v1654_v62, %v1148_v30  ;;  %v1227_v42 = vsel (!%p1658_p3), %vm1219_vm13, %v1176_v33, 0.0 }
 0x3e4   : > { %v1175_v3 = vadd.f32 %v1654_v62, %v1140_v32  ;;  %v1225_v40 = vsel (!%p1658_p3), %vm1217_vm11, %v1174_v2, 0.0 }
 0x3e5   : > { %v1183_v4 = vpack.c.bf16 %v1177_v1, %v1176_v33  ;;  %v1228_v45 = vsel (!%p1658_p3), %vm1220_vm14, %v1177_v1, 0.0 }
 0x3e6   : > { %v1182_v5 = vpack.c.bf16 %v1175_v3, %v1174_v2  ;;  %v1226_v41 = vsel (!%p1658_p3), %vm1218_vm12, %v1175_v3, 0.0 }
 0x3e7   : > { %1192 = vst [vmem:[%s1190_s4 + $0x8] sm:$0xff] %v1183_v4  ;;  %v1233_v44 = vadd.f32 (!%p1658_p3), %v1226_v41, %v1225_v40 }
 0x3e8   : > { %1191 = vst [vmem:[%s1190_s4] sm:$0xff] %v1182_v5 }
 0x3e9   : > { %v1234_v47 = vadd.f32 (!%p1658_p3), %v1233_v44, %v1227_v42 }
 0x3eb   : > { %v1235_v49 = vadd.f32 (!%p1658_p3), %v1234_v47, %v1228_v45 }
 0x3fe   : > { %v1834_v6 = vpop.f32.mrb[4].mxu1 }
 0x3ff   : > { %v1152_v7 = vpop.f32.mrb[5].mxu1  ;;  %v1180_v9 = vadd.f32 %v1834_v6, %v1654_v62 }
 0x400   : > { %v1835_v8 = vpop.f32.mrb[6].mxu1  ;;  %v1178_v12 = vadd.f32 %v1654_v62, %v1152_v7  ;;  %1198 = sbr.rel (%p1658_p3) target bundleno = 1535 (0x5ff), region = 76 }
 0x401   : > { %v1181_v10 = vadd.f32 %v1835_v8, %v1654_v62  ;;  %v1155_v11 = vpop.f32.mrb[7].mxu1  ;;  %v1231_v52 = vsel (!%p1658_p3), %vm1223_vm1, %v1180_v9, 0.0 }
 0x402   : > { %v1179_v13 = vadd.f32 %v1654_v62, %v1155_v11  ;;  %v1229_v48 = vsel (!%p1658_p3), %vm1221_vm15, %v1178_v12, 0.0 }
 0x403   : > { %v1185_v14 = vpack.c.bf16 %v1181_v10, %v1180_v9  ;;  %v1236_v51 = vadd.f32 (!%p1658_p3), %v1235_v49, %v1229_v48  ;;  %v1232_v54 = vsel (!%p1658_p3), %vm1224_vm2, %v1181_v10, 0.0 }
 0x404   : > { %v1184_v15 = vpack.c.bf16 %v1179_v13, %v1178_v12  ;;  %v1230_v50 = vsel (!%p1658_p3), %vm1222_vm0, %v1179_v13, 0.0 }
 0x405   : > { %1194 = vst [vmem:[%s1190_s4 + $0x18] sm:$0xff] %v1185_v14  ;;  %v1237_v53 = vadd.f32 (!%p1658_p3), %v1236_v51, %v1230_v50 }
 0x406   : > { %1193 = vst [vmem:[%s1190_s4 + $0x10] sm:$0xff] %v1184_v15 }
 0x407   : > { %v1238_v55 = vadd.f32 %v1237_v53, %v1231_v52  ;;  %v2285_v27 = vmov (!%p1659_p1), 0.0  }
 0x408   : > { %1250 = vst [vmem:[#allocation4] sm:$0x1] (!%p1659_p1), %v2285_v27 }
 0x409   : > { %v1239_v56 = vadd.f32 %v1238_v55, %v1232_v54 }
 0x40b   : > { %v1240_v57 = vrot.slane %v1239_v56, 4 }
 0x40d   : > { %v1241_v58 = vadd.f32 %v1240_v57, %v1239_v56 }
 0x40f   : > { %v1242_v59 = vrot.slane %v1241_v58, 2  ;;  %1249 = sbr.rel (%p1659_p1) target bundleno = 1046 (0x416), region = 80 }
 0x411   : > { %v1243_v60 = vadd.f32 %v1242_v59, %v1241_v58 }
 0x413   : > { %v1244_v61 = vrot.slane %v1243_v60, 1 }
 0x415   : > { %v1245_v26 = vadd.f32 %v1244_v61, %v1243_v60 }
 0x416 PF: > { %v1251_v28 = vld [vmem:[#allocation4] sm:$0x1]  ;;  %p1660_p4 = scmp.ne.s32.totalorder %s2260_s30, 3 }
 0x417   : > { %v1252_v29 = vadd.f32 %v1251_v28, %v1245_v26  ;;  %v1260_v62 = vld [vmem:[#allocation8] sm:$0xff] (!%p1660_p4)  ;;  %v1261_v63 = vld [vmem:[#allocation8 + $0x8] sm:$0xff] (!%p1660_p4)  ;;  %v1262_v0 = vld [vmem:[#allocation8 + $0x10] sm:$0xff] (!%p1660_p4)  ;;  %v2286_v30 = vmov (!%p1660_p4), 0.0|0.0   ;;  %vm2287_vm3 = vmmov (!%p1660_p4), 0   ;;  %v2288_v33 = vmov (!%p1660_p4), 0.0  }
 0x418   : > { %1257 = sbr.rel (%p1660_p4) target bundleno = 1535 (0x5ff), region = 84  ;;  %1906 = vmatprep.subr.bf16.mxu0 (!%p1660_p4), %v2286_v30  ;;  %v1907_v31 = vpack.c.bf16 (!%p1660_p4), %v1261_v63, %v1260_v62  ;;  %v1263_v32 = vld [vmem:[#allocation8 + $0x18] sm:$0xff] (!%p1660_p4)  ;;  %1868 = vmatprep.mubr.msk.f32.mxu0 (!%p1660_p4), %vm2287_vm3, %v2288_v33  ;;  %v1264_v2 = vld [vmem:[#allocation8 + $0x20] sm:$0xff] (!%p1660_p4)  ;;  %v1265_v3 = vld [vmem:[#allocation8 + $0x28] sm:$0xff] (!%p1660_p4)  ;;  %vm1441_vm5 = vcmask (!%p1660_p4), 8192  }
 0x419   : > { %1253 = vst [vmem:[#allocation4] sm:$0x1] %v1252_v29  ;;  %1930 = vmatprep.subr.bf16.mxu1 (!%p1660_p4), %v2286_v30  ;;  %1903 = vmatprep.mubr.msk.f32.mxu1 (!%p1660_p4), %vm2287_vm3, %v2288_v33  ;;  %v1910_v1 = vpack.c.bf16 (!%p1660_p4), %v1263_v32, %v1262_v0  ;;  %v1349_v4 = vld [vmem:[%s2842_s7] sm:$0xff] (!%p1660_p4)  ;;  %v1350_v5 = vld [vmem:[%s2842_s7 + $0x8] sm:$0xff] (!%p1660_p4)  ;;  %v1351_v6 = vld [vmem:[%s2842_s7 + $0x10] sm:$0xff] (!%p1660_p4)  ;;  %v1913_v8 = vpack.c.bf16 (!%p1660_p4), %v1265_v3, %v1264_v2 }
 0x41a   : > { %1908 = vmatpush3.bf16.msra.mxu0 (!%p1660_p4), %v1907_v31  ;;  %v1352_v7 = vld [vmem:[%s2842_s7 + $0x18] sm:$0xff] (!%p1660_p4)  ;;  %v1931_v9 = vpack.c.bf16 (!%p1660_p4), %v1350_v5, %v1349_v4  ;;  %v1353_v13 = vld [vmem:[%s2842_s7 + $0x20] sm:$0xff] (!%p1660_p4)  ;;  %v1354_v14 = vld [vmem:[%s2842_s7 + $0x28] sm:$0xff] (!%p1660_p4) }
 0x41b   : > { %1909 = vmatprep.subr.bf16.mxu0 (!%p1660_p4), %v2286_v30  ;;  %v1266_v10 = vld [vmem:[#allocation8 + $0x30] sm:$0xff] (!%p1660_p4)  ;;  %v1267_v11 = vld [vmem:[#allocation8 + $0x38] sm:$0xff] (!%p1660_p4)  ;;  %v1934_v12 = vpack.c.bf16 (!%p1660_p4), %v1352_v7, %v1351_v6  ;;  %v1268_v16 = vld [vmem:[#allocation8 + $0x40] sm:$0xff] (!%p1660_p4)  ;;  %v1937_v18 = vpack.c.bf16 (!%p1660_p4), %v1354_v14, %v1353_v13 }
 0x41c   : > { %1932 = vmatpush3.bf16.msra.mxu1 (!%p1660_p4), %v1931_v9  ;;  %v1916_v15 = vpack.c.bf16 (!%p1660_p4), %v1267_v11, %v1266_v10  ;;  %v1269_v17 = vld [vmem:[#allocation8 + $0x48] sm:$0xff] (!%p1660_p4)  ;;  %v1356_v20 = vld [vmem:[%s2842_s7 + $0x38] sm:$0xff] (!%p1660_p4)  ;;  %v1357_v25 = vld [vmem:[%s2842_s7 + $0x40] sm:$0xff] (!%p1660_p4) }
 0x41d   : > { %1933 = vmatprep.subr.bf16.mxu1 (!%p1660_p4), %v2286_v30  ;;  %v1355_v19 = vld [vmem:[%s2842_s7 + $0x30] sm:$0xff] (!%p1660_p4)  ;;  %v1919_v21 = vpack.c.bf16 (!%p1660_p4), %v1269_v17, %v1268_v16  ;;  %v1271_v23 = vld [vmem:[#allocation8 + $0x58] sm:$0xff] (!%p1660_p4)  ;;  %v1358_v34 = vld [vmem:[%s2842_s7 + $0x48] sm:$0xff] (!%p1660_p4) }
 0x41e   : > { %1911 = vmatpush3.bf16.msra.mxu0 (!%p1660_p4), %v1910_v1  ;;  %v1270_v22 = vld [vmem:[#allocation8 + $0x50] sm:$0xff] (!%p1660_p4)  ;;  %v1940_v24 = vpack.c.bf16 (!%p1660_p4), %v1356_v20, %v1355_v19  ;;  %v1272_v36 = vld [vmem:[#allocation8 + $0x60] sm:$0xff] (!%p1660_p4)  ;;  %v1273_v37 = vld [vmem:[#allocation8 + $0x68] sm:$0xff] (!%p1660_p4)  ;;  %v1943_v38 = vpack.c.bf16 (!%p1660_p4), %v1358_v34, %v1357_v25 }
 0x41f   : > { %1912 = vmatprep.subr.bf16.mxu0 %v2286_v30  ;;  %v1922_v35 = vpack.c.bf16 %v1271_v23, %v1270_v22  ;;  %v1359_v39 = vld [vmem:[%s2842_s7 + $0x50] sm:$0xff]  ;;  %v1360_v40 = vld [vmem:[%s2842_s7 + $0x58] sm:$0xff]  ;;  %v1925_v41 = vpack.c.bf16 %v1273_v37, %v1272_v36  ;;  %v1361_v45 = vld [vmem:[%s2842_s7 + $0x60] sm:$0xff] }
 0x420   : > { %1935 = vmatpush3.bf16.msra.mxu1 %v1934_v12  ;;  %v1274_v42 = vld [vmem:[#allocation8 + $0x70] sm:$0xff]  ;;  %v1275_v43 = vld [vmem:[#allocation8 + $0x78] sm:$0xff]  ;;  %v1946_v44 = vpack.c.bf16 %v1360_v40, %v1359_v39  ;;  %v1362_v46 = vld [vmem:[%s2842_s7 + $0x68] sm:$0xff] }
 0x421   : > { %1936 = vmatprep.subr.bf16.mxu1 %v2286_v30  ;;  %v1928_v47 = vpack.c.bf16 %v1275_v43, %v1274_v42  ;;  %v1258_v48 = vld [vmem:[#allocation4] sm:$0x1]  ;;  %v1949_v49 = vpack.c.bf16 %v1362_v46, %v1361_v45  ;;  %v1363_v51 = vld [vmem:[%s2842_s7 + $0x70] sm:$0xff]  ;;  %v1364_v52 = vld [vmem:[%s2842_s7 + $0x78] sm:$0xff] }
 0x422   : > { %1914 = vmatpush3.bf16.msra.mxu0 %v1913_v8  ;;  %v1259_v50 = vmul.f32 0.005, %v1258_v48  ;;  %v1952_v53 = vpack.c.bf16 %v1364_v52, %v1363_v51 }
 0x423   : > { %1915 = vmatprep.subr.bf16.mxu0 %v2286_v30 }
 0x424   : > { %1938 = vmatpush3.bf16.msra.mxu1 %v1937_v18 }
 0x425   : > { %1939 = vmatprep.subr.bf16.mxu1 %v2286_v30 }
 0x426   : > { %1917 = vmatpush3.bf16.msra.mxu0 %v1916_v15 }
 0x427   : > { %1918 = vmatprep.subr.bf16.mxu0 %v2286_v30 }
 0x428   : > { %1941 = vmatpush3.bf16.msra.mxu1 %v1940_v24 }
 0x429   : > { %1942 = vmatprep.subr.bf16.mxu1 %v2286_v30 }
 0x42a   : > { %1920 = vmatpush3.bf16.msra.mxu0 %v1919_v21 }
 0x42b   : > { %1921 = vmatprep.subr.bf16.mxu0 %v2286_v30 }
 0x42c   : > { %1944 = vmatpush3.bf16.msra.mxu1 %v1943_v38 }
 0x42d   : > { %1945 = vmatprep.subr.bf16.mxu1 %v2286_v30 }
 0x42e   : > { %1923 = vmatpush3.bf16.msra.mxu0 %v1922_v35 }
 0x42f   : > { %1924 = vmatprep.subr.bf16.mxu0 %v2286_v30 }
 0x430   : > { %1947 = vmatpush3.bf16.msra.mxu1 %v1946_v44 }
 0x431   : > { %1948 = vmatprep.subr.bf16.mxu1 %v2286_v30 }
 0x432   : > { %1926 = vmatpush3.bf16.msra.mxu0 %v1925_v41 }
 0x433   : > { %1927 = vmatprep.subr.bf16.mxu0 %v2286_v30 }
 0x434   : > { %1950 = vmatpush3.bf16.msra.mxu1 %v1949_v49 }
 0x435   : > { %1951 = vmatprep.subr.bf16.mxu1 %v2286_v30 }
 0x436   : > { %1929 = vmatpush3.bf16.msra.mxu0 %v1928_v47 }
 0x438   : > { %1953 = vmatpush3.bf16.msra.mxu1 %v1952_v53 }
 0x439   : > { %1869 = vmatmul.mubr.f32.vlgmr.msra.gmra.mrb[0].mxu0 %v1259_v50 }
 0x50c   : > { %v1342_v54 = vpop.f32.mrb[0].mxu0 }
 0x50d   : > { %vm1346_vm4 = vcmp.gt.f32.partialorder %v1342_v54, 0.0  ;;  %v1347_v55 = vmul.f32 0.01, %v1342_v54  ;;  %v1870_v56 = vpop.f32.mrb[1].mxu0 }
 0x50f   : > { %v1348_v57 = vsel %vm1346_vm4, %v1342_v54, %v1347_v55 }
 0x510   : > { %1904 = vmatmul.mubr.f32.vlgmr.msra.gmra.mrb[0].mxu1 %v1348_v57 }
 0x5e3   : > { %v1431_v58 = vpop.f32.mrb[0].mxu1 }
 0x5e4   : > { %v1661_v59 = vmul.f32 -1.442695, %v1431_v58  ;;  %v1905_v60 = vpop.f32.mrb[1].mxu1 }
 0x5e6   : > { %2114 = vpow2.f32 %v1661_v59 }
 0x5f0   : > { %v2115_v61 = vpop.eup %2114 }
 0x5f1   : > { %v1438_v26 = vadd.f32 1.0, %v2115_v61 }
 0x5f3   : > { %2116 = vrcp.f32 %v1438_v26 }
 0x5fd   : > { %v2117_v27 = vpop.eup %2116 }
 0x5fe   : > { %1442 = vst.msk [vmem:[#allocation10] sm:$0x1] %vm1441_vm5, %v2117_v27 }
 0x5ff PF: > { %s2870_s25 = sadd.s32 4294967295, %s2276_s12   ;;  %s2289_s18 = smov [#allocation10]  }
 0x600   : > { %p2785_p2 = scmp.eq.s32.totalorder %s2870_s25, 11  ;;  %s1450_s13 = sshll.u32 %s2289_s18, 4  ;;  %s1451_s13 = int_to_ptr.vmem [resolvable:$true] %s1450_s13 }
 0x601   : > { %s2176_s26 = scalar_lea.vmem %s1451_s13, 16  ;;  %s2182_s15 = scalar_lea.vmem %s1451_s13, 32 }
 0x602   : > { %p2177_p6 = scmp.ne.s32.totalorder %s1451_s13, %s2176_s26  ;;  %p2183_p8 = scmp.lt.s32.totalorder %s1451_s13, %s1451_s13 }
 0x603   : > { %p2184_p9 = scmp.lt.s32.totalorder %s2182_s15, %s2176_s26 }
 0x604   : > { %p2178_p5 = pnand %p2177_p6, %p2785_p2 }
 0x605   : > { %p2185_p7 = por %p2184_p9, %p2183_p8 }
 0x606   : > { %p2179_p13 = pneg %p2178_p5 }
 0x608   : > { %p2186_p10 = pnand %p2185_p7, %p2179_p13 }
 0x60a   : > { %2189 = shalt.err (!%p2186_p10)
}
 0x60b   : > { %s2190_s27 = scalar_lea.hbm %s2843_s8, 16 }
 0x60c   : > { %p2191_p11 = scmp.ne.s32.totalorder %s2843_s8, %s2190_s27  ;;  %p2196_p3 = scmp.lt.u32.totalorder %s2190_s27, %s2843_s8 }
 0x60e   : > { %p2192_p12 = pnand %p2191_p11, %p2785_p2 }
 0x610   : > { %p2193_p0 = pneg %p2192_p12 }
 0x612   : > { %p2198_p1 = pnand %p2196_p3, %p2193_p0 }
 0x614   : > { %2201 = shalt.err (!%p2198_p1)
}
 0x615   : > { %1989 = dma.vmem_to_hbm [thread:$0]  (%p2785_p2), %s1451_s13, 16, %s2843_s8, [#allocation7]  }
 0x616   : > { %2243 = dma.done.wait (%p2785_p2), [#allocation7], 16  }
 0x617   : > { %2245 = vsyncadd (%p2785_p2), [#allocation7], 4294967280 }
 0x618 PF: > { %s23_s12 = sadd.s32 1, %s2276_s12   ;;  %s2872_s10 = sld [smem:[#allocation18_spill]] }
 0x619   : > { %p20_p4 = scmp.ge.s32.totalorder %s23_s12, 14   ;;  %s2873_s30 = sld [smem:[#allocation14_spill]] }
 0x61a   : > { %s2874_s9 = sld [smem:[#allocation15_spill]]  ;;  %s2875_s20 = sld [smem:[#allocation16_spill]] }
 0x61b   : > { %s2876_s11 = sld [smem:[#allocation17_spill]]  ;;  %s2877_s27 = smov %s2252_s28 }
 0x61c   : > { %s2878_s28 = smov %s2256_s29  ;;  %22 = sbr.rel (!%p20_p4) target bundleno = 10 (0xa), region = 136 }
 0x61e   : > { %s2879_s29 = smov %s2872_s10 }
 0x620   : > { %s2880_s10 = smov %s2875_s20 }
 0x623   :  { %1463 = vsyncpa [#allocation6], 1 }
 0x624   :  { %1465 = vsyncpa [#allocation6 + $0x1], 1 }
 0x625   :  { %1466 = vsyncpa [#allocation9], 1 }
 0x626   :  { %1467 = vsyncpa [#allocation7], 1 }
 0x627   :  { %1469 = vsyncpa [#allocation7 + $0x1], 1 }

</bundles_post_ra>
